<compile_context>
chip_gen: v7x
topology: tpu7x:2x2x1
jax: 0.10.0
libtpu: 0.0.40
codegen_flags: <defaults>
</compile_context>

<pallas_src>
import functools

import jax
import jax.numpy as jnp
import numpy as np
from jax.experimental import pallas as pl
from jax.experimental.pallas import tpu as pltpu


# --------------------------------------------------------------------------
# Laplacian kernel coefficients (host-side, numpy)
# --------------------------------------------------------------------------
def get_laplacian_kernel2d(kernel_size: int) -> np.ndarray:
    if (not isinstance(kernel_size, int) or kernel_size % 2 == 0
            or kernel_size <= 0):
        raise TypeError(
            "ksize must be an odd positive integer. Got {}".format(kernel_size))
    kernel = np.ones((kernel_size, kernel_size), dtype=np.float32)
    mid = kernel_size // 2
    kernel[mid, mid] = 1.0 - kernel_size ** 2
    return kernel


def normalize_kernel2d(kernel: np.ndarray) -> np.ndarray:
    return kernel / np.abs(kernel).sum()


# --------------------------------------------------------------------------
# Pallas kernel body: one (channel-tile, H-band) grid step
# --------------------------------------------------------------------------
def _laplacian_band_kernel(x_ref, x_hbm, o_ref,
                           top_ref, bot_ref, vsum_ref, sem, *,
                           K, H, W, bh, ct, pad,
                           w_off, w_center, border_type):
    """x_ref : (ct, bh, W)  auto-pipelined interior band
       x_hbm : (BC, H, W)   raw HBM view of the same tensor (halo DMAs)
       o_ref : (ct, bh, W)  output band
       top_ref/bot_ref : (ct, max(pad,1), W) halo-row scratch (x.dtype)
       vsum_ref: (ct, bh, W + 2*pad) f32 row-summed, column-padded scratch
    """
    f32 = jnp.float32
    c = pl.program_id(0)
    h = pl.program_id(1)
    n_h = pl.num_programs(1)
    c0 = c * ct
    row0 = h * bh
    circular = (border_type == "circular")

    def halo_copy(dst_ref, src_row, slot):
        return pltpu.make_async_copy(
            x_hbm.at[pl.ds(c0, ct), pl.ds(src_row, pad), :],
            dst_ref, sem.at[slot])

    # ---- Kick off the tiny halo-row DMAs first so they hide under the
    #      interior row sums ---------------------------------------------------
    if pad > 0:
        if circular:
            top_src = jnp.where(h > 0, row0 - pad, H - pad)           # wrap
            bot_src = jnp.where(h < n_h - 1, row0 + bh, 0)            # wrap
            halo_copy(top_ref, top_src, 0).start()
            halo_copy(bot_ref, bot_src, 1).start()
        else:
            @pl.when(h > 0)
            def _():
                halo_copy(top_ref, row0 - pad, 0).start()

            @pl.when(h < n_h - 1)
            def _():
                halo_copy(bot_ref, row0 + bh, 1).start()

    # ---- Vertical pass (interior rows): separable K-row sums into vsum ------
    # vsum[:, r, pad:pad+W] accumulates sum_{dy} x_padded[row0 + r - pad + dy].
    vsum_ref[:, :, pad:pad + W] = x_ref[...].astype(f32)              # dy == pad
    for dy in range(K):
        if dy == pad:
            continue
        n = bh - abs(dy - pad)
        dst = max(pad - dy, 0)
        src = max(dy - pad, 0)
        vsum_ref[:, dst:dst + n, pad:pad + W] = (
            vsum_ref[:, dst:dst + n, pad:pad + W]
            + x_ref[:, src:src + n, :].astype(f32))

    if pad > 0:
        # ---- Image-edge bands: synthesize missing halo rows in-kernel -------
        if not circular:
            @pl.when(h == 0)
            def _():
                if border_type == "constant":
                    top_ref[...] = jnp.zeros((ct, pad, W), top_ref.dtype)
                else:
                    for j in range(pad):
                        s = 0 if border_type == "replicate" else pad - j
                        top_ref[:, j:j + 1, :] = x_ref[:, s:s + 1, :]

            @pl.when(h == n_h - 1)
            def _():
                if border_type == "constant":
                    bot_ref[...] = jnp.zeros((ct, pad, W), bot_ref.dtype)
                else:
                    for j in range(pad):
                        s = bh - 1 if border_type == "replicate" else bh - 2 - j
                        bot_ref[:, j:j + 1, :] = x_ref[:, s:s + 1, :]

        # ---- Wait for the halo DMAs (only when one was started) -------------
        if circular:
            halo_copy(top_ref, 0, 0).wait()
            halo_copy(bot_ref, 0, 1).wait()
        else:
            @pl.when(h > 0)
            def _():
                halo_copy(top_ref, 0, 0).wait()

            @pl.when(h < n_h - 1)
            def _():
                halo_copy(bot_ref, 0, 1).wait()

        # ---- Fold halo rows into the first / last output rows ---------------
        for dy in range(pad):                 # taps above the band
            rows = pad - dy
            vsum_ref[:, 0:rows, pad:pad + W] = (
                vsum_ref[:, 0:rows, pad:pad + W]
                + top_ref[:, dy:pad, :].astype(f32))
        for dy in range(pad + 1, K):          # taps below the band
            rows = dy - pad
            vsum_ref[:, bh - rows:bh, pad:pad + W] = (
                vsum_ref[:, bh - rows:bh, pad:pad + W]
                + bot_ref[:, 0:rows, :].astype(f32))

        # ---- Column (W-axis) border padding of the row-summed buffer --------
        # (padding a column copies a single source column, so it commutes with
        #  the row sum; batched stores where the layout allows it)
        if border_type == "constant":
            vsum_ref[:, :, 0:pad] = jnp.zeros((ct, bh, pad), f32)
            vsum_ref[:, :, pad + W:pad + W + pad] = jnp.zeros((ct, bh, pad), f32)
        elif border_type == "replicate":
            vsum_ref[:, :, 0:pad] = jnp.broadcast_to(
                vsum_ref[:, :, pad:pad + 1], (ct, bh, pad))
            vsum_ref[:, :, pad + W:pad + W + pad] = jnp.broadcast_to(
                vsum_ref[:, :, pad + W - 1:pad + W], (ct, bh, pad))
        elif circular:
            vsum_ref[:, :, 0:pad] = vsum_ref[:, :, W:W + pad]
            vsum_ref[:, :, pad + W:pad + W + pad] = vsum_ref[:, :, pad:2 * pad]
        else:  # reflect (order-reversed -> per-column; pad is tiny)
            for j in range(pad):
                vsum_ref[:, :, j:j + 1] = vsum_ref[:, :, 2 * pad - j:2 * pad - j + 1]
                vsum_ref[:, :, pad + W + j:pad + W + j + 1] = (
                    vsum_ref[:, :, pad + W - 2 - j:pad + W - 1 - j])

    # ---- Horizontal pass (shifted reads from the scratch ref) + center ------
    box = vsum_ref[:, :, 0:W]
    for dx in range(1, K):
        box = box + vsum_ref[:, :, dx:dx + W]
    out = w_off * box + (w_center - w_off) * x_ref[...].astype(f32)
    o_ref[...] = out.astype(o_ref.dtype)


# --------------------------------------------------------------------------
# Tiling / VMEM budgeting
# --------------------------------------------------------------------------
def _round_up(a, b):
    return (a + b - 1) // b * b


def _vmem_budget():
    try:
        cap = int(pltpu.get_tpu_info().vmem_capacity_bytes)
    except Exception:
        cap = 64 * 1024 * 1024          # conservative (v7x per-core VMEM)
    limit = min(int(cap * 0.70), 100 * 1024 * 1024)   # ~45 MiB v7x, ~90 MiB v5e/v6e
    limit = max(limit, 32 * 1024 * 1024)
    budget = int(limit * 0.70)          # head-room for compiler temporaries
    return budget, limit


def _pick_tiles(BC, H, W, pad, esize, budget, max_band_rows=None):
    """Pick (channel tile ct, band rows bh) maximizing block size under an
    honest VMEM estimate, preferring >=2 grid steps (v7x has 2 TCs)."""
    Wl = _round_up(W, 128)
    Wpl = _round_up(W + 2 * pad, 128)

    def cost(ct, bh):
        bh8 = _round_up(bh, 8)
        in_out = 4 * ct * bh8 * Wl * esize                       # 2x dbl-buffered blocks
        halo = 2 * ct * _round_up(max(pad, 1), 8) * Wl * esize   # halo scratch
        vsum = ct * bh8 * Wpl * 4                                # f32 row-sum scratch
        temps = 3 * ct * bh8 * Wl * 4                            # compiler temporaries
        return in_out + halo + vsum + temps

    cap_rows = H if max_band_rows is None else min(H, max(int(max_band_rows), 1))
    bh_cands = {d for d in range(8, cap_rows + 1, 8) if H % d == 0 and d > pad}
    if H <= cap_rows:
        bh_cands.add(H)
    if not bh_cands:
        bh_cands = {H}                     # single full-height band fallback
    ct_cands = sorted(d for d in range(1, BC + 1) if BC % d == 0)

    feasible = []
    for bh in sorted(bh_cands):
        for ct in ct_cands:
            if cost(ct, bh) <= budget:
                feasible.append((ct, bh, (BC // ct) * (H // bh)))
    if not feasible:
        bh = min(bh_cands)
        return 1, bh, cost(1, bh)
    multi = [f for f in feasible if f[2] >= 2]
    pool = multi if multi else feasible
    ct, bh, _ = max(pool, key=lambda f: (f[0] * f[1], f[1]))   # volume, then tall bands
    return ct, bh, cost(ct, bh)


# --------------------------------------------------------------------------
# Public wrapper: (B, C, H, W) -> (B, C, H, W)
# --------------------------------------------------------------------------
def laplacian(x: jax.Array, kernel_size: int, border_type: str = "reflect",
              normalized: bool = True, *, max_band_rows=None) -> jax.Array:
    if x.ndim != 4:
        raise ValueError("expected (B, C, H, W), got {}".format(x.shape))
    if border_type not in ("constant", "reflect", "replicate", "circular"):
        raise ValueError("bad border_type: {}".format(border_type))

    K = int(kernel_size)
    kern = get_laplacian_kernel2d(K)
    if normalized:
        if K == 1:
            raise ValueError("kernel_size=1 with normalized=True has zero L1 norm")
        kern = normalize_kernel2d(kern)
    mid = K // 2
    pad = (K - 1) // 2
    w_center = float(kern[mid, mid])
    w_off = float(kern[0, 0]) if K > 1 else 0.0

    B, C, H, W = x.shape
    if not (H > pad and W > pad):
        raise ValueError("kernel_size too large for spatial extent "
                         "(need pad < H and pad < W)")

    BC = B * C
    x2 = x.reshape(BC, H, W)               # free view; no HBM relayout

    esize = np.dtype(x.dtype).itemsize
    budget, vmem_limit = _vmem_budget()
    ct, bh, est = _pick_tiles(BC, H, W, pad, esize, budget, max_band_rows)
    vmem_limit = max(vmem_limit, est + 8 * 1024 * 1024)
    pad_s = max(pad, 1)

    kernel_fn = functools.partial(
        _laplacian_band_kernel, K=K, H=H, W=W, bh=bh, ct=ct, pad=pad,
        w_off=w_off, w_center=w_center, border_type=border_type)

    out2 = pl.pallas_call(
        kernel_fn,
        out_shape=jax.ShapeDtypeStruct((BC, H, W), x.dtype),
        grid_spec=pltpu.PrefetchScalarGridSpec(
            num_scalar_prefetch=0,
            grid=(BC // ct, H // bh),
            in_specs=[
                pl.BlockSpec((ct, bh, W), lambda c, h: (c, h, 0)),  # interior band
                pl.BlockSpec(memory_space=pl.ANY),                  # raw HBM (halo DMAs)
            ],
            out_specs=pl.BlockSpec((ct, bh, W), lambda c, h: (c, h, 0)),
            scratch_shapes=[
                pltpu.VMEM((ct, pad_s, W), x.dtype),                # top halo rows
                pltpu.VMEM((ct, pad_s, W), x.dtype),                # bottom halo rows
                pltpu.VMEM((ct, bh, W + 2 * pad), jnp.float32),     # row-sum scratch
                pltpu.SemaphoreType.DMA((2,)),
            ],
        ),
        compiler_params=pltpu.CompilerParams(
            dimension_semantics=("parallel", "parallel"),
            vmem_limit_bytes=int(vmem_limit),
        ),
    )(x2, x2)

    return out2.reshape(B, C, H, W)


# --------------------------------------------------------------------------
# Pure-JAX reference (no Pallas) for the correctness check
# --------------------------------------------------------------------------
def _reference_laplacian(x, kernel_size, border_type="reflect", normalized=True):
    kern = get_laplacian_kernel2d(kernel_size)
    if normalized:
        kern = normalize_kernel2d(kern)
    pad = (kernel_size - 1) // 2
    mode = {"reflect": "reflect", "replicate": "edge",
            "constant": "constant", "circular": "wrap"}[border_type]
    xp = jnp.pad(x, ((0, 0), (0, 0), (pad, pad), (pad, pad)), mode=mode) if pad else x
    B, C, H, W = x.shape
    out = jnp.zeros(x.shape, jnp.float32)
    for dy in range(kernel_size):
        for dx in range(kernel_size):
            out = out + float(kern[dy, dx]) * xp[:, :, dy:dy + H, dx:dx + W].astype(jnp.float32)
    return out.astype(x.dtype)


if __name__ == "__main__":
    key = jax.random.PRNGKey(0)
    B, C, H, W = 2, 4, 16, 16
    x = jax.random.normal(key, (B, C, H, W), dtype=jnp.float32)

    # 1) default config (reflect, K=5), auto-chosen tiling
    out = jax.block_until_ready(laplacian(x, 5, border_type="reflect"))
    ref = _reference_laplacian(x, 5, border_type="reflect")
    assert out.shape == (B, C, H, W)
    np.testing.assert_allclose(np.asarray(out), np.asarray(ref), rtol=1e-5, atol=1e-5)

    # 2) banded path with halo DMAs + circular (wrap) border
    out = jax.block_until_ready(laplacian(x, 3, border_type="circular", max_band_rows=8))
    ref = _reference_laplacian(x, 3, border_type="circular")
    np.testing.assert_allclose(np.asarray(out), np.asarray(ref), rtol=1e-5, atol=1e-5)

    # 3) banded path (interior halo DMAs + edge fills) + replicate border
    out = jax.block_until_ready(laplacian(x, 5, border_type="replicate", max_band_rows=8))
    ref = _reference_laplacian(x, 5, border_type="replicate")
    np.testing.assert_allclose(np.asarray(out), np.asarray(ref), rtol=1e-5, atol=1e-5)

    print("KERNEL_OK")
</pallas_src>

<mosaic_0001>
module attributes {stable_mosaic.version = 11 : i64} {
  func.func @_laplacian_band_kernel(%arg0: i32, %arg1: i32, %arg2: memref<4x16x16xf32, #tpu.memory_space<vmem>>, %arg3: memref<8x16x16xf32, #tpu.memory_space<any>>, %arg4: memref<4x16x16xf32, #tpu.memory_space<vmem>>, %arg5: memref<4x2x16xf32, #tpu.memory_space<vmem>>, %arg6: memref<4x2x16xf32, #tpu.memory_space<vmem>>, %arg7: memref<4x16x20xf32, #tpu.memory_space<vmem>>, %arg8: memref<2x!tpu.dma_semaphore, #tpu.memory_space<semaphore_mem>>) attributes {dimension_semantics = [#tpu.dimension_semantics<parallel>, #tpu.dimension_semantics<parallel>], iteration_bounds = array<i64: 2, 1>, scalar_prefetch = 0 : i64, scratch_operands = 4 : i64, tpu.core_type = #tpu.core_type<tc>, window_params = [{transform_indices = @transform_0, window_bounds = array<i64: 4, 16, 16>}, {}, {transform_indices = @transform_2, window_bounds = array<i64: 4, 16, 16>}]} {
    %c4_i32 = arith.constant 4 : i32
    %0 = arith.muli %arg0, %c4_i32 : i32
    %c16_i32 = arith.constant 16 : i32
    %1 = arith.muli %arg1, %c16_i32 : i32
    %c0_i32 = arith.constant 0 : i32
    %2 = arith.cmpi sgt, %arg1, %c0_i32 : i32
    %3 = arith.extui %2 : i1 to i32
    %c0_i32_0 = arith.constant 0 : i32
    %4 = arith.cmpi ne, %3, %c0_i32_0 : i32
    scf.if %4 {
      %c2_i32 = arith.constant 2 : i32
      %78 = arith.subi %1, %c2_i32 : i32
      %c0_i32_125 = arith.constant 0 : i32
      %c0_i32_126 = arith.constant 0 : i32
      %79 = tpu.memref_slice %arg3[%0, %78, %c0_i32_126] : memref<8x16x16xf32, #tpu.memory_space<any>> -> memref<4x2x16xf32, #tpu.memory_space<any>>
      %80 = tpu.memref_slice %arg8[%c0_i32_125] : memref<2x!tpu.dma_semaphore, #tpu.memory_space<semaphore_mem>> -> memref<1x!tpu.dma_semaphore, #tpu.memory_space<semaphore_mem>>
      %81 = tpu.memref_squeeze %80 : memref<1x!tpu.dma_semaphore, #tpu.memory_space<semaphore_mem>> -> memref<!tpu.dma_semaphore, #tpu.memory_space<semaphore_mem>>
      tpu.enqueue_dma source(%79 : memref<4x2x16xf32, #tpu.memory_space<any>>) target(%arg5 : memref<4x2x16xf32, #tpu.memory_space<vmem>>) target_semaphore(%81 : memref<!tpu.dma_semaphore, #tpu.memory_space<semaphore_mem>>)
    } else {
    }
    %c0_i32_1 = arith.constant 0 : i32
    %5 = arith.cmpi slt, %arg1, %c0_i32_1 : i32
    %6 = arith.extui %5 : i1 to i32
    %c0_i32_2 = arith.constant 0 : i32
    %7 = arith.cmpi ne, %6, %c0_i32_2 : i32
    scf.if %7 {
      %c16_i32_125 = arith.constant 16 : i32
      %78 = arith.addi %1, %c16_i32_125 : i32
      %c1_i32 = arith.constant 1 : i32
      %c0_i32_126 = arith.constant 0 : i32
      %79 = tpu.memref_slice %arg3[%0, %78, %c0_i32_126] : memref<8x16x16xf32, #tpu.memory_space<any>> -> memref<4x2x16xf32, #tpu.memory_space<any>>
      %80 = tpu.memref_slice %arg8[%c1_i32] : memref<2x!tpu.dma_semaphore, #tpu.memory_space<semaphore_mem>> -> memref<1x!tpu.dma_semaphore, #tpu.memory_space<semaphore_mem>>
      %81 = tpu.memref_squeeze %80 : memref<1x!tpu.dma_semaphore, #tpu.memory_space<semaphore_mem>> -> memref<!tpu.dma_semaphore, #tpu.memory_space<semaphore_mem>>
      tpu.enqueue_dma source(%79 : memref<4x2x16xf32, #tpu.memory_space<any>>) target(%arg6 : memref<4x2x16xf32, #tpu.memory_space<vmem>>) target_semaphore(%81 : memref<!tpu.dma_semaphore, #tpu.memory_space<semaphore_mem>>)
    } else {
    }
    %c0 = arith.constant 0 : index
    %c0_3 = arith.constant 0 : index
    %c0_4 = arith.constant 0 : index
    %8 = vector.load %arg2[%c0, %c0_3, %c0_4] : memref<4x16x16xf32, #tpu.memory_space<vmem>>, vector<4x16x16xf32>
    %c0_5 = arith.constant 0 : index
    %c0_6 = arith.constant 0 : index
    %c2 = arith.constant 2 : index
    %9 = vector.load %arg7[%c0_5, %c0_6, %c2] : memref<4x16x20xf32, #tpu.memory_space<vmem>>, vector<4x16x16xf32>
    tpu.vector_store %arg7[%c0_5, %c0_6, %c2], %8 {strides = array<i32>} : memref<4x16x20xf32, #tpu.memory_space<vmem>>, vector<4x16x16xf32>,
    %c0_7 = arith.constant 0 : index
    %c2_8 = arith.constant 2 : index
    %c2_9 = arith.constant 2 : index
    %10 = vector.load %arg7[%c0_7, %c2_8, %c2_9] : memref<4x16x20xf32, #tpu.memory_space<vmem>>, vector<4x14x16xf32>
    %c0_10 = arith.constant 0 : index
    %c0_11 = arith.constant 0 : index
    %c0_12 = arith.constant 0 : index
    %11 = vector.load %arg2[%c0_10, %c0_11, %c0_12] : memref<4x16x16xf32, #tpu.memory_space<vmem>>, vector<4x14x16xf32>
    %12 = arith.addf %10, %11 : vector<4x14x16xf32>
    %c0_13 = arith.constant 0 : index
    %c2_14 = arith.constant 2 : index
    %c2_15 = arith.constant 2 : index
    %13 = vector.load %arg7[%c0_13, %c2_14, %c2_15] : memref<4x16x20xf32, #tpu.memory_space<vmem>>, vector<4x14x16xf32>
    tpu.vector_store %arg7[%c0_13, %c2_14, %c2_15], %12 {strides = array<i32>} : memref<4x16x20xf32, #tpu.memory_space<vmem>>, vector<4x14x16xf32>,
    %c0_16 = arith.constant 0 : index
    %c1 = arith.constant 1 : index
    %c2_17 = arith.constant 2 : index
    %14 = vector.load %arg7[%c0_16, %c1, %c2_17] : memref<4x16x20xf32, #tpu.memory_space<vmem>>, vector<4x15x16xf32>
    %c0_18 = arith.constant 0 : index
    %c0_19 = arith.constant 0 : index
    %c0_20 = arith.constant 0 : index
    %15 = vector.load %arg2[%c0_18, %c0_19, %c0_20] : memref<4x16x16xf32, #tpu.memory_space<vmem>>, vector<4x15x16xf32>
    %16 = arith.addf %14, %15 : vector<4x15x16xf32>
    %c0_21 = arith.constant 0 : index
    %c1_22 = arith.constant 1 : index
    %c2_23 = arith.constant 2 : index
    %17 = vector.load %arg7[%c0_21, %c1_22, %c2_23] : memref<4x16x20xf32, #tpu.memory_space<vmem>>, vector<4x15x16xf32>
    tpu.vector_store %arg7[%c0_21, %c1_22, %c2_23], %16 {strides = array<i32>} : memref<4x16x20xf32, #tpu.memory_space<vmem>>, vector<4x15x16xf32>,
    %c0_24 = arith.constant 0 : index
    %c0_25 = arith.constant 0 : index
    %c2_26 = arith.constant 2 : index
    %18 = vector.load %arg7[%c0_24, %c0_25, %c2_26] : memref<4x16x20xf32, #tpu.memory_space<vmem>>, vector<4x15x16xf32>
    %c0_27 = arith.constant 0 : index
    %c1_28 = arith.constant 1 : index
    %c0_29 = arith.constant 0 : index
    %19 = vector.load %arg2[%c0_27, %c1_28, %c0_29] : memref<4x16x16xf32, #tpu.memory_space<vmem>>, vector<4x15x16xf32>
    %20 = arith.addf %18, %19 : vector<4x15x16xf32>
    %c0_30 = arith.constant 0 : index
    %c0_31 = arith.constant 0 : index
    %c2_32 = arith.constant 2 : index
    %21 = vector.load %arg7[%c0_30, %c0_31, %c2_32] : memref<4x16x20xf32, #tpu.memory_space<vmem>>, vector<4x15x16xf32>
    tpu.vector_store %arg7[%c0_30, %c0_31, %c2_32], %20 {strides = array<i32>} : memref<4x16x20xf32, #tpu.memory_space<vmem>>, vector<4x15x16xf32>,
    %c0_33 = arith.constant 0 : index
    %c0_34 = arith.constant 0 : index
    %c2_35 = arith.constant 2 : index
    %22 = vector.load %arg7[%c0_33, %c0_34, %c2_35] : memref<4x16x20xf32, #tpu.memory_space<vmem>>, vector<4x14x16xf32>
    %c0_36 = arith.constant 0 : index
    %c2_37 = arith.constant 2 : index
    %c0_38 = arith.constant 0 : index
    %23 = vector.load %arg2[%c0_36, %c2_37, %c0_38] : memref<4x16x16xf32, #tpu.memory_space<vmem>>, vector<4x14x16xf32>
    %24 = arith.addf %22, %23 : vector<4x14x16xf32>
    %c0_39 = arith.constant 0 : index
    %c0_40 = arith.constant 0 : index
    %c2_41 = arith.constant 2 : index
    %25 = vector.load %arg7[%c0_39, %c0_40, %c2_41] : memref<4x16x20xf32, #tpu.memory_space<vmem>>, vector<4x14x16xf32>
    tpu.vector_store %arg7[%c0_39, %c0_40, %c2_41], %24 {strides = array<i32>} : memref<4x16x20xf32, #tpu.memory_space<vmem>>, vector<4x14x16xf32>,
    %c0_i32_42 = arith.constant 0 : i32
    %26 = arith.cmpi eq, %arg1, %c0_i32_42 : i32
    %27 = arith.extui %26 : i1 to i32
    %c0_i32_43 = arith.constant 0 : i32
    %28 = arith.cmpi ne, %27, %c0_i32_43 : i32
    scf.if %28 {
      %c0_125 = arith.constant 0 : index
      %c2_126 = arith.constant 2 : index
      %c0_127 = arith.constant 0 : index
      %78 = vector.load %arg2[%c0_125, %c2_126, %c0_127] : memref<4x16x16xf32, #tpu.memory_space<vmem>>, vector<4x1x16xf32>
      %c0_128 = arith.constant 0 : index
      %c0_129 = arith.constant 0 : index
      %c0_130 = arith.constant 0 : index
      %79 = vector.load %arg5[%c0_128, %c0_129, %c0_130] : memref<4x2x16xf32, #tpu.memory_space<vmem>>, vector<4x1x16xf32>
      tpu.vector_store %arg5[%c0_128, %c0_129, %c0_130], %78 {strides = array<i32>} : memref<4x2x16xf32, #tpu.memory_space<vmem>>, vector<4x1x16xf32>,
      %c0_131 = arith.constant 0 : index
      %c1_132 = arith.constant 1 : index
      %c0_133 = arith.constant 0 : index
      %80 = vector.load %arg2[%c0_131, %c1_132, %c0_133] : memref<4x16x16xf32, #tpu.memory_space<vmem>>, vector<4x1x16xf32>
      %c0_134 = arith.constant 0 : index
      %c1_135 = arith.constant 1 : index
      %c0_136 = arith.constant 0 : index
      %81 = vector.load %arg5[%c0_134, %c1_135, %c0_136] : memref<4x2x16xf32, #tpu.memory_space<vmem>>, vector<4x1x16xf32>
      tpu.vector_store %arg5[%c0_134, %c1_135, %c0_136], %80 {strides = array<i32>} : memref<4x2x16xf32, #tpu.memory_space<vmem>>, vector<4x1x16xf32>,
    } else {
    }
    %c0_i32_44 = arith.constant 0 : i32
    %29 = arith.cmpi eq, %arg1, %c0_i32_44 : i32
    %30 = arith.extui %29 : i1 to i32
    %c0_i32_45 = arith.constant 0 : i32
    %31 = arith.cmpi ne, %30, %c0_i32_45 : i32
    scf.if %31 {
      %c0_125 = arith.constant 0 : index
      %c14_126 = arith.constant 14 : index
      %c0_127 = arith.constant 0 : index
      %78 = vector.load %arg2[%c0_125, %c14_126, %c0_127] : memref<4x16x16xf32, #tpu.memory_space<vmem>>, vector<4x1x16xf32>
      %c0_128 = arith.constant 0 : index
      %c0_129 = arith.constant 0 : index
      %c0_130 = arith.constant 0 : index
      %79 = vector.load %arg6[%c0_128, %c0_129, %c0_130] : memref<4x2x16xf32, #tpu.memory_space<vmem>>, vector<4x1x16xf32>
      tpu.vector_store %arg6[%c0_128, %c0_129, %c0_130], %78 {strides = array<i32>} : memref<4x2x16xf32, #tpu.memory_space<vmem>>, vector<4x1x16xf32>,
      %c0_131 = arith.constant 0 : index
      %c13 = arith.constant 13 : index
      %c0_132 = arith.constant 0 : index
      %80 = vector.load %arg2[%c0_131, %c13, %c0_132] : memref<4x16x16xf32, #tpu.memory_space<vmem>>, vector<4x1x16xf32>
      %c0_133 = arith.constant 0 : index
      %c1_134 = arith.constant 1 : index
      %c0_135 = arith.constant 0 : index
      %81 = vector.load %arg6[%c0_133, %c1_134, %c0_135] : memref<4x2x16xf32, #tpu.memory_space<vmem>>, vector<4x1x16xf32>
      tpu.vector_store %arg6[%c0_133, %c1_134, %c0_135], %80 {strides = array<i32>} : memref<4x2x16xf32, #tpu.memory_space<vmem>>, vector<4x1x16xf32>,
    } else {
    }
    %c0_i32_46 = arith.constant 0 : i32
    %32 = arith.cmpi sgt, %arg1, %c0_i32_46 : i32
    %33 = arith.extui %32 : i1 to i32
    %c0_i32_47 = arith.constant 0 : i32
    %34 = arith.cmpi ne, %33, %c0_i32_47 : i32
    scf.if %34 {
      %c0_i32_125 = arith.constant 0 : i32
      %c0_i32_126 = arith.constant 0 : i32
      %c0_i32_127 = arith.constant 0 : i32
      %78 = tpu.memref_slice %arg3[%0, %c0_i32_126, %c0_i32_127] : memref<8x16x16xf32, #tpu.memory_space<any>> -> memref<4x2x16xf32, #tpu.memory_space<any>>
      %79 = tpu.memref_slice %arg8[%c0_i32_125] : memref<2x!tpu.dma_semaphore, #tpu.memory_space<semaphore_mem>> -> memref<1x!tpu.dma_semaphore, #tpu.memory_space<semaphore_mem>>
      %80 = tpu.memref_squeeze %79 : memref<1x!tpu.dma_semaphore, #tpu.memory_space<semaphore_mem>> -> memref<!tpu.dma_semaphore, #tpu.memory_space<semaphore_mem>>
      tpu.wait_dma2 semaphore(%80 : memref<!tpu.dma_semaphore, #tpu.memory_space<semaphore_mem>>) src(%78 : memref<4x2x16xf32, #tpu.memory_space<any>>) dst(%arg5 : memref<4x2x16xf32, #tpu.memory_space<vmem>>)
    } else {
    }
    %c0_i32_48 = arith.constant 0 : i32
    %35 = arith.cmpi slt, %arg1, %c0_i32_48 : i32
    %36 = arith.extui %35 : i1 to i32
    %c0_i32_49 = arith.constant 0 : i32
    %37 = arith.cmpi ne, %36, %c0_i32_49 : i32
    scf.if %37 {
      %c1_i32 = arith.constant 1 : i32
      %c0_i32_125 = arith.constant 0 : i32
      %c0_i32_126 = arith.constant 0 : i32
      %78 = tpu.memref_slice %arg3[%0, %c0_i32_125, %c0_i32_126] : memref<8x16x16xf32, #tpu.memory_space<any>> -> memref<4x2x16xf32, #tpu.memory_space<any>>
      %79 = tpu.memref_slice %arg8[%c1_i32] : memref<2x!tpu.dma_semaphore, #tpu.memory_space<semaphore_mem>> -> memref<1x!tpu.dma_semaphore, #tpu.memory_space<semaphore_mem>>
      %80 = tpu.memref_squeeze %79 : memref<1x!tpu.dma_semaphore, #tpu.memory_space<semaphore_mem>> -> memref<!tpu.dma_semaphore, #tpu.memory_space<semaphore_mem>>
      tpu.wait_dma2 semaphore(%80 : memref<!tpu.dma_semaphore, #tpu.memory_space<semaphore_mem>>) src(%78 : memref<4x2x16xf32, #tpu.memory_space<any>>) dst(%arg6 : memref<4x2x16xf32, #tpu.memory_space<vmem>>)
    } else {
    }
    %c0_50 = arith.constant 0 : index
    %c0_51 = arith.constant 0 : index
    %c2_52 = arith.constant 2 : index
    %38 = vector.load %arg7[%c0_50, %c0_51, %c2_52] : memref<4x16x20xf32, #tpu.memory_space<vmem>>, vector<4x2x16xf32>
    %c0_53 = arith.constant 0 : index
    %c0_54 = arith.constant 0 : index
    %c0_55 = arith.constant 0 : index
    %39 = vector.load %arg5[%c0_53, %c0_54, %c0_55] : memref<4x2x16xf32, #tpu.memory_space<vmem>>, vector<4x2x16xf32>
    %40 = arith.addf %38, %39 : vector<4x2x16xf32>
    %c0_56 = arith.constant 0 : index
    %c0_57 = arith.constant 0 : index
    %c2_58 = arith.constant 2 : index
    %41 = vector.load %arg7[%c0_56, %c0_57, %c2_58] : memref<4x16x20xf32, #tpu.memory_space<vmem>>, vector<4x2x16xf32>
    tpu.vector_store %arg7[%c0_56, %c0_57, %c2_58], %40 {strides = array<i32>} : memref<4x16x20xf32, #tpu.memory_space<vmem>>, vector<4x2x16xf32>,
    %c0_59 = arith.constant 0 : index
    %c0_60 = arith.constant 0 : index
    %c2_61 = arith.constant 2 : index
    %42 = vector.load %arg7[%c0_59, %c0_60, %c2_61] : memref<4x16x20xf32, #tpu.memory_space<vmem>>, vector<4x1x16xf32>
    %c0_62 = arith.constant 0 : index
    %c1_63 = arith.constant 1 : index
    %c0_64 = arith.constant 0 : index
    %43 = vector.load %arg5[%c0_62, %c1_63, %c0_64] : memref<4x2x16xf32, #tpu.memory_space<vmem>>, vector<4x1x16xf32>
    %44 = arith.addf %42, %43 : vector<4x1x16xf32>
    %c0_65 = arith.constant 0 : index
    %c0_66 = arith.constant 0 : index
    %c2_67 = arith.constant 2 : index
    %45 = vector.load %arg7[%c0_65, %c0_66, %c2_67] : memref<4x16x20xf32, #tpu.memory_space<vmem>>, vector<4x1x16xf32>
    tpu.vector_store %arg7[%c0_65, %c0_66, %c2_67], %44 {strides = array<i32>} : memref<4x16x20xf32, #tpu.memory_space<vmem>>, vector<4x1x16xf32>,
    %c0_68 = arith.constant 0 : index
    %c15 = arith.constant 15 : index
    %c2_69 = arith.constant 2 : index
    %46 = vector.load %arg7[%c0_68, %c15, %c2_69] : memref<4x16x20xf32, #tpu.memory_space<vmem>>, vector<4x1x16xf32>
    %c0_70 = arith.constant 0 : index
    %c0_71 = arith.constant 0 : index
    %c0_72 = arith.constant 0 : index
    %47 = vector.load %arg6[%c0_70, %c0_71, %c0_72] : memref<4x2x16xf32, #tpu.memory_space<vmem>>, vector<4x1x16xf32>
    %48 = arith.addf %46, %47 : vector<4x1x16xf32>
    %c0_73 = arith.constant 0 : index
    %c15_74 = arith.constant 15 : index
    %c2_75 = arith.constant 2 : index
    %49 = vector.load %arg7[%c0_73, %c15_74, %c2_75] : memref<4x16x20xf32, #tpu.memory_space<vmem>>, vector<4x1x16xf32>
    tpu.vector_store %arg7[%c0_73, %c15_74, %c2_75], %48 {strides = array<i32>} : memref<4x16x20xf32, #tpu.memory_space<vmem>>, vector<4x1x16xf32>,
    %c0_76 = arith.constant 0 : index
    %c14 = arith.constant 14 : index
    %c2_77 = arith.constant 2 : index
    %50 = vector.load %arg7[%c0_76, %c14, %c2_77] : memref<4x16x20xf32, #tpu.memory_space<vmem>>, vector<4x2x16xf32>
    %c0_78 = arith.constant 0 : index
    %c0_79 = arith.constant 0 : index
    %c0_80 = arith.constant 0 : index
    %51 = vector.load %arg6[%c0_78, %c0_79, %c0_80] : memref<4x2x16xf32, #tpu.memory_space<vmem>>, vector<4x2x16xf32>
    %52 = arith.addf %50, %51 : vector<4x2x16xf32>
    %c0_81 = arith.constant 0 : index
    %c14_82 = arith.constant 14 : index
    %c2_83 = arith.constant 2 : index
    %53 = vector.load %arg7[%c0_81, %c14_82, %c2_83] : memref<4x16x20xf32, #tpu.memory_space<vmem>>, vector<4x2x16xf32>
    tpu.vector_store %arg7[%c0_81, %c14_82, %c2_83], %52 {strides = array<i32>} : memref<4x16x20xf32, #tpu.memory_space<vmem>>, vector<4x2x16xf32>,
    %c0_84 = arith.constant 0 : index
    %c0_85 = arith.constant 0 : index
    %c4 = arith.constant 4 : index
    %54 = vector.load %arg7[%c0_84, %c0_85, %c4] : memref<4x16x20xf32, #tpu.memory_space<vmem>>, vector<4x16x1xf32>
    %c0_86 = arith.constant 0 : index
    %c0_87 = arith.constant 0 : index
    %c0_88 = arith.constant 0 : index
    %55 = vector.load %arg7[%c0_86, %c0_87, %c0_88] : memref<4x16x20xf32, #tpu.memory_space<vmem>>, vector<4x16x1xf32>
    tpu.vector_store %arg7[%c0_86, %c0_87, %c0_88], %54 {strides = array<i32>} : memref<4x16x20xf32, #tpu.memory_space<vmem>>, vector<4x16x1xf32>,
    %c0_89 = arith.constant 0 : index
    %c0_90 = arith.constant 0 : index
    %c16 = arith.constant 16 : index
    %56 = vector.load %arg7[%c0_89, %c0_90, %c16] : memref<4x16x20xf32, #tpu.memory_space<vmem>>, vector<4x16x1xf32>
    %c0_91 = arith.constant 0 : index
    %c0_92 = arith.constant 0 : index
    %c18 = arith.constant 18 : index
    %57 = vector.load %arg7[%c0_91, %c0_92, %c18] : memref<4x16x20xf32, #tpu.memory_space<vmem>>, vector<4x16x1xf32>
    tpu.vector_store %arg7[%c0_91, %c0_92, %c18], %56 {strides = array<i32>} : memref<4x16x20xf32, #tpu.memory_space<vmem>>, vector<4x16x1xf32>,
    %c0_93 = arith.constant 0 : index
    %c0_94 = arith.constant 0 : index
    %c3 = arith.constant 3 : index
    %58 = vector.load %arg7[%c0_93, %c0_94, %c3] : memref<4x16x20xf32, #tpu.memory_space<vmem>>, vector<4x16x1xf32>
    %c0_95 = arith.constant 0 : index
    %c0_96 = arith.constant 0 : index
    %c1_97 = arith.constant 1 : index
    %59 = vector.load %arg7[%c0_95, %c0_96, %c1_97] : memref<4x16x20xf32, #tpu.memory_space<vmem>>, vector<4x16x1xf32>
    tpu.vector_store %arg7[%c0_95, %c0_96, %c1_97], %58 {strides = array<i32>} : memref<4x16x20xf32, #tpu.memory_space<vmem>>, vector<4x16x1xf32>,
    %c0_98 = arith.constant 0 : index
    %c0_99 = arith.constant 0 : index
    %c15_100 = arith.constant 15 : index
    %60 = vector.load %arg7[%c0_98, %c0_99, %c15_100] : memref<4x16x20xf32, #tpu.memory_space<vmem>>, vector<4x16x1xf32>
    %c0_101 = arith.constant 0 : index
    %c0_102 = arith.constant 0 : index
    %c19 = arith.constant 19 : index
    %61 = vector.load %arg7[%c0_101, %c0_102, %c19] : memref<4x16x20xf32, #tpu.memory_space<vmem>>, vector<4x16x1xf32>
    tpu.vector_store %arg7[%c0_101, %c0_102, %c19], %60 {strides = array<i32>} : memref<4x16x20xf32, #tpu.memory_space<vmem>>, vector<4x16x1xf32>,
    %c0_103 = arith.constant 0 : index
    %c0_104 = arith.constant 0 : index
    %c0_105 = arith.constant 0 : index
    %62 = vector.load %arg7[%c0_103, %c0_104, %c0_105] : memref<4x16x20xf32, #tpu.memory_space<vmem>>, vector<4x16x16xf32>
    %c0_106 = arith.constant 0 : index
    %c0_107 = arith.constant 0 : index
    %c1_108 = arith.constant 1 : index
    %63 = vector.load %arg7[%c0_106, %c0_107, %c1_108] : memref<4x16x20xf32, #tpu.memory_space<vmem>>, vector<4x16x16xf32>
    %64 = arith.addf %62, %63 : vector<4x16x16xf32>
    %c0_109 = arith.constant 0 : index
    %c0_110 = arith.constant 0 : index
    %c2_111 = arith.constant 2 : index
    %65 = vector.load %arg7[%c0_109, %c0_110, %c2_111] : memref<4x16x20xf32, #tpu.memory_space<vmem>>, vector<4x16x16xf32>
    %66 = arith.addf %64, %65 : vector<4x16x16xf32>
    %c0_112 = arith.constant 0 : index
    %c0_113 = arith.constant 0 : index
    %c3_114 = arith.constant 3 : index
    %67 = vector.load %arg7[%c0_112, %c0_113, %c3_114] : memref<4x16x20xf32, #tpu.memory_space<vmem>>, vector<4x16x16xf32>
    %68 = arith.addf %66, %67 : vector<4x16x16xf32>
    %c0_115 = arith.constant 0 : index
    %c0_116 = arith.constant 0 : index
    %c4_117 = arith.constant 4 : index
    %69 = vector.load %arg7[%c0_115, %c0_116, %c4_117] : memref<4x16x20xf32, #tpu.memory_space<vmem>>, vector<4x16x16xf32>
    %70 = arith.addf %68, %69 : vector<4x16x16xf32>
    %cst = arith.constant 0.020833334 : f32
    %71 = vector.broadcast %cst : f32 to vector<4x16x16xf32>
    %72 = arith.mulf %71, %70 : vector<4x16x16xf32>
    %c0_118 = arith.constant 0 : index
    %c0_119 = arith.constant 0 : index
    %c0_120 = arith.constant 0 : index
    %73 = vector.load %arg2[%c0_118, %c0_119, %c0_120] : memref<4x16x16xf32, #tpu.memory_space<vmem>>, vector<4x16x16xf32>
    %cst_121 = arith.constant -0.520833313 : f32
    %74 = vector.broadcast %cst_121 : f32 to vector<4x16x16xf32>
    %75 = arith.mulf %74, %73 : vector<4x16x16xf32>
    %76 = arith.addf %72, %75 : vector<4x16x16xf32>
    %c0_122 = arith.constant 0 : index
    %c0_123 = arith.constant 0 : index
    %c0_124 = arith.constant 0 : index
    %77 = vector.load %arg4[%c0_122, %c0_123, %c0_124] : memref<4x16x16xf32, #tpu.memory_space<vmem>>, vector<4x16x16xf32>
    tpu.vector_store %arg4[%c0_122, %c0_123, %c0_124], %76 {strides = array<i32>} : memref<4x16x16xf32, #tpu.memory_space<vmem>>, vector<4x16x16xf32>,
    return
  }
  func.func @transform_0(%arg0: i32, %arg1: i32) -> (i32, i32, i32) {
    %c0_i32 = arith.constant 0 : i32
    %c0_i32_0 = arith.constant 0 : i32
    return %arg0, %arg1, %c0_i32 : i32, i32, i32
  }
  func.func @transform_2(%arg0: i32, %arg1: i32) -> (i32, i32, i32) {
    %c0_i32 = arith.constant 0 : i32
    %c0_i32_0 = arith.constant 0 : i32
    return %arg0, %arg1, %c0_i32 : i32, i32, i32
  }
}

</mosaic_0001>

<bundles_post_ra>
// kernel: tpu_custom_call.1
= control target key start
LH: loop header
LB: loop body
LE: loop exit
PB: predicated region body
PF: predicated region fallthrough
CT: control target
= control target key end

     0   :  { %7 = vsyncpa [#allocation7], 0  ;;  %s1948_s0 = inlined_call_operand.hbm [shape: f32[8,16,16], index: 0, kind: input, shape index: {}]   ;;  %s1949_s1 = inlined_call_operand.hbm [shape: f32[8,16,16], index: 1, kind: input, shape index: {}]   ;;  %s1950_s2 = inlined_call_operand.hbm [shape: f32[8,16,16], index: 2, kind: output, shape index: {}]  }
   0x1   :  { %9 = vsyncpa [#allocation7 + $0x1], 0 }
   0x2   :  { %10 = vsyncpa [#allocation8], 0 }
   0x3   :  { %12 = vsyncpa [#allocation8 + $0x1], 0  ;;  %s1430_s9 = smov 0   ;;  %s1432_s10 = smov 0  }
   0x4   :  { %s1434_s11 = smov 0   ;;  %s1436_s12 = smov 0  }
   0x5   :  { %s1438_s13 = smov 0   ;;  %s1440_s14 = smov 0  }
   0x6 LB: > { %s1187_s1 = sadd.s32 4294967295, %s1401_s14   ;;  %s1188_s15 = sadd.s32 4294967294, %s1401_s14   ;;  %s1401_s14 = sphi %s1440_s14, %s18_s14   ;;  %s1397_s13 = sphi %s1438_s13, %s1965_s13   ;;  %s1393_s12 = sphi %s1436_s12, %s1964_s12   ;;  %s1389_s11 = sphi %s1434_s11, %s1963_s11   ;;  %s1385_s10 = sphi %s1432_s10, %s1962_s10   ;;  %s1381_s9 = sphi %s1430_s9, %s1961_s9  }
   0x7   : > { %s30_s16 = sadd.s32 1, %s1397_s13  ;;  %s39_s17 = sadd.s32 1, %s1389_s11 }
   0x8   : > { %p32_p0 = scmp.ge.s32.totalorder %s30_s16, 2  ;;  %p46_p1 = scmp.ne.s32.totalorder %s1389_s11, %s1385_s10 }
   0x9   : > { %p47_p2 = scmp.eq.s32.totalorder %s1401_s14, 0  ;;  %p52_p3 = scmp.ne.s32.totalorder %s1385_s10, %s1381_s9 }
   0xa   : > { %s1967_s16 = smov (%p32_p0, %s30_s16), 0  ;;  %p53_p5 = scmp.eq.s32.totalorder %s1187_s1, 0 }
   0xb   : > { %p1471_p4 = por %p47_p2, %p46_p1  ;;  %s34_s19 = ssub.s32 %s1397_s13, %s1967_s16 }
   0xc   : > { %p78_p6 = scmp.eq.s32.totalorder %s1187_s1, 1  ;;  %p37_p7 = scmp.eq.s32.totalorder %s34_s19, 0 }
   0xd   : > { %p1477_p8 = por %p53_p5, %p52_p3  ;;  %p84_p10 = scmp.eq.s32.totalorder %s1188_s15, 1 }
   0xe   : > { %p1481_p9 = por %p78_p6, %p46_p1  ;;  %p1229_p13 = scmp.lt.s32.totalorder %s1401_s14, 2 }
   0xf   : > { %s1486_s22 = scalar_select %p37_p7, %s1389_s11, %s39_s17  }
  0x10   : > { %s1954_s21 = scalar_select %p1481_p9, 1, 0 }
  0x11   : > { %p1488_p11 = por %p84_p10, %p52_p3  ;;  %s104_s24 = sand.u32 1, %s1389_s11  }
  0x12   : > { %s1191_s25 = sshll.u32 %s104_s24, 6  ;;  %s1212_s26 = sshll.u32 %s1397_s13, 10 }
  0x13   : > { %s1955_s23 = scalar_select %p1488_p11, 1, 0 }
  0x14   : > { %s1499_s29 = scalar_lea.hbm %s1948_s0, %s1212_s26  ;;  %s108_s30 = scalar_lea.vmem [#allocation6], %s1191_s25 }
  0x15   : > { %s118_s3 = sshll.u32 %s108_s30, 4  ;;  %p1505_p0 = pnand %p1229_p13, %p1471_p4  ;;  %s1501_s3 = int_to_ptr.vmem [resolvable:$true] %s118_s3 }
  0x16   : > { %s1510_s5 = scalar_lea.sflag [#allocation7], %s104_s24  ;;  %s1289_s6 = scalar_lea.hbm %s1499_s29, 1024 }
  0x17   : > { %p1290_p2 = scmp.ne.s32.totalorder %s1499_s29, %s1289_s6  ;;  %p1291_p3 = pneg %p1505_p0 }
  0x18   : > { %s1294_s1 = scalar_lea.hbm %s1948_s0, 2048  ;;  %p1295_p4 = scmp.lt.u32.totalorder %s1499_s29, %s1948_s0 }
  0x19   : > { %p1292_p5 = pnand %p1291_p3, %p1290_p2  ;;  %p1296_p7 = scmp.lt.u32.totalorder %s1294_s1, %s1289_s6 }
  0x1a   : > { %p1298_p13 = scmp.lt.u32.totalorder %s1289_s6, %s1499_s29 }
  0x1b   : > { %p1293_p6 = pneg %p1292_p5  ;;  %p1297_p10 = por %p1296_p7, %p1295_p4 }
  0x1d   : > { %p1299_p12 = por %p1298_p13, %p1297_p10 }
  0x1f   : > { %p1300_p1 = pnand %p1299_p12, %p1293_p6 }
  0x21   : > { %1303 = shalt.err (!%p1300_p1)
}
  0x22   : > { %s1304_s18 = scalar_lea.vmem %s1501_s3, 1024  ;;  %s1403_s19 = smov [#allocation6]  }
  0x23   : > { %p1305_p2 = scmp.ne.s32.totalorder %s1501_s3, %s1304_s18  ;;  %s1309_s24 = sshll.u32 %s1403_s19, 4  ;;  %s1310_s24 = int_to_ptr.vmem [resolvable:$false] %s1309_s24 }
  0x24   : > { %s1311_s25 = scalar_lea.vmem %s1310_s24, 2048  ;;  %p1312_p9 = scmp.lt.s32.totalorder %s1501_s3, %s1310_s24 }
  0x25   : > { %p1307_p5 = pnand %p1305_p2, %p1291_p3  ;;  %p1313_p4 = scmp.lt.s32.totalorder %s1311_s25, %s1304_s18 }
  0x27   : > { %p1308_p11 = pneg %p1307_p5  ;;  %p1314_p7 = por %p1313_p4, %p1312_p9 }
  0x29   : > { %p1315_p10 = pnand %p1314_p7, %p1308_p11 }
  0x2b   : > { %1318 = shalt.err (!%p1315_p10)
}
  0x2c   : > { %s1404_s26 = smov 128   ;;  %s1405_s27 = smov 8  }
  0x2d   : > { %1224 = dma.hbm_to_vmem [thread:$0]  (!%p1505_p0), %s1499_s29, 1024, %s1501_s3, %s1510_s5, %s1404_s26, %s1404_s26, %s1405_s27  }
  0x2e   : > { %p126_p12 = scmp.lt.s32.totalorder %s1401_s14, 3  ;;  %p1957_p1 = scmp.ge.s32.totalorder %s1401_s14, 1 }
  0x30   : > { %p127_p3 = pnand %p1957_p1, %p126_p12 }
  0x31   : > { %s1542_s28 = sand.u32 (!%p127_p3), 1, %s1385_s10  }
  0x32   : > { %130 = sbr.rel (%p127_p3) target bundleno = 976 (0x3d0), region = 24  ;;  %s1196_s30 = sshll.u32 (!%p127_p3), %s1542_s28, 6 }
  0x33   : > { %s133_s6 = scalar_lea.sflag (!%p127_p3), [#allocation7], %s1542_s28  ;;  %s1548_s7 = scalar_lea.vmem (!%p127_p3), [#allocation6], %s1196_s30 }
  0x39   : > { %1372 = dma.done.wait (%p1477_p8), %s133_s6, 1024  }
  0x3a   : > { %1374 = vsyncadd (%p1477_p8), %s133_s6, 4294966272  ;;  %v192_v0 = vld [vmem:[%s1548_s7 + $0x10] sm:$0xff]  ;;  %v190_v1 = vld [vmem:[%s1548_s7] sm:$0xff]  ;;  %s1406_s29 = smov 2   ;;  %vm505_vm0 = vcmask 122880   ;;  %vm230_vm1 = vcmask 146448  }
  0x3b   : > { %210 = vrot.lane.b32.xlu1 %v192_v0, %s1406_s29  ;;  %206 = vrot.lane.b32.xlu0 %v190_v1, %s1406_s29  ;;  %v193_v2 = vld [vmem:[%s1548_s7 + $0x18] sm:$0xff]  ;;  %v191_v3 = vld [vmem:[%s1548_s7 + $0x8] sm:$0xff]  ;;  %vm296_vm2 = vcmask 144400   ;;  %vm361_vm3 = vcmask 145424   ;;  %vm577_vm4 = vcmask 140304   ;;  %vm610_vm5 = vcmask 139280  }
  0x3c   : > { %v195_v4 = vld [vmem:[%s1548_s7 + $0x28] sm:$0xff]  ;;  %v194_v5 = vld [vmem:[%s1548_s7 + $0x20] sm:$0xff]  ;;  %v197_v6 = vld [vmem:[%s1548_s7 + $0x38] sm:$0xff]  ;;  %s1407_s20 = smov 124   ;;  %vm719_vm6 = vcmask 7168   ;;  %vm768_vm7 = vcmask 154768  }
  0x3d   : > { %v196_v7 = vld [vmem:[%s1548_s7 + $0x30] sm:$0xff]  ;;  %v501_v10 = vld [vmem:[%s1548_s7 + $0x2] sm:$0x1]  ;;  %v510_v11 = vld [vmem:[%s1548_s7 + $0x1] sm:$0x1]  ;;  %s1408_s3 = smov 126  }
  0x3e   : > { %v502_v8 = vld [vmem:[%s1548_s7 + $0x12] sm:$0x1]  ;;  %v511_v9 = vld [vmem:[%s1548_s7 + $0x11] sm:$0x1]  ;;  %506 = vst.msk [vmem:[#allocation2] sm:$0x1] %vm505_vm0, %v501_v10 }
  0x3f   : > { %212 = vrot.lane.b32.xlu1 %v193_v2, %s1406_s29  ;;  %208 = vrot.lane.b32.xlu0 %v191_v3, %s1406_s29  ;;  %507 = vst.msk [vmem:[#allocation2 + $0x2] sm:$0x1] %vm505_vm0, %v502_v8  ;;  %515 = vst.msk [vmem:[#allocation2 + $0x3] sm:$0x1] %vm505_vm0, %v511_v9  ;;  %v504_v12 = vld [vmem:[%s1548_s7 + $0x32] sm:$0x1] }
  0x40   : > { %514 = vst.msk [vmem:[#allocation2 + $0x1] sm:$0x1] %vm505_vm0, %v510_v11  ;;  %509 = vst.msk [vmem:[#allocation2 + $0x6] sm:$0x1] %vm505_vm0, %v504_v12  ;;  %v513_v13 = vld [vmem:[%s1548_s7 + $0x31] sm:$0x1] }
  0x41   : > { %v503_v14 = vld [vmem:[%s1548_s7 + $0x22] sm:$0x1]  ;;  %v512_v15 = vld [vmem:[%s1548_s7 + $0x21] sm:$0x1]  ;;  %517 = vst.msk [vmem:[#allocation2 + $0x7] sm:$0x1] %vm505_vm0, %v513_v13 }
  0x42   : > { %508 = vst.msk [vmem:[#allocation2 + $0x4] sm:$0x1] %vm505_vm0, %v503_v14  ;;  %516 = vst.msk [vmem:[#allocation2 + $0x5] sm:$0x1] %vm505_vm0, %v512_v15  ;;  %v519_v16 = vld [vmem:[%s1548_s7 + $0x1e] sm:$0x1] }
  0x43   : > { %216 = vrot.lane.b32.xlu1 %v195_v4, %s1406_s29  ;;  %214 = vrot.lane.b32.xlu0 %v194_v5, %s1406_s29  ;;  %v518_v17 = vld [vmem:[%s1548_s7 + $0xe] sm:$0x1]  ;;  %523 = vst.msk [vmem:[#allocation3 + $0x2] sm:$0x1] %vm505_vm0, %v519_v16  ;;  %v521_v18 = vld [vmem:[%s1548_s7 + $0x3e] sm:$0x1] }
  0x44   : > { %522 = vst.msk [vmem:[#allocation3] sm:$0x1] %vm505_vm0, %v518_v17  ;;  %v520_v19 = vld [vmem:[%s1548_s7 + $0x2e] sm:$0x1]  ;;  %525 = vst.msk [vmem:[#allocation3 + $0x6] sm:$0x1] %vm505_vm0, %v521_v18 }
  0x45   : > { %524 = vst.msk [vmem:[#allocation3 + $0x4] sm:$0x1] %vm505_vm0, %v520_v19  ;;  %v527_v20 = vld [vmem:[%s1548_s7 + $0x1d] sm:$0x1]  ;;  %v526_v21 = vld [vmem:[%s1548_s7 + $0xd] sm:$0x1] }
  0x46   : > { %v529_v22 = vld [vmem:[%s1548_s7 + $0x3d] sm:$0x1]  ;;  %531 = vst.msk [vmem:[#allocation3 + $0x3] sm:$0x1] %vm505_vm0, %v527_v20  ;;  %530 = vst.msk [vmem:[#allocation3 + $0x1] sm:$0x1] %vm505_vm0, %v526_v21 }
  0x47   : > { %220 = vrot.lane.b32.xlu1 %v197_v6, %s1406_s29  ;;  %218 = vrot.lane.b32.xlu0 %v196_v7, %s1406_s29  ;;  %533 = vst.msk [vmem:[#allocation3 + $0x7] sm:$0x1] %vm505_vm0, %v529_v22  ;;  %v528_v23 = vld [vmem:[%s1548_s7 + $0x2d] sm:$0x1]  ;;  %v250_v24 = vld [vmem:[%s1548_s7 + $0x18] sm:$0x3f] }
  0x48   : > { %532 = vst.msk [vmem:[#allocation3 + $0x5] sm:$0x1] %vm505_vm0, %v528_v23  ;;  %v248_v25 = vld [vmem:[%s1548_s7 + $0x8] sm:$0x3f]  ;;  %v254_v26 = vld [vmem:[%s1548_s7 + $0x38] sm:$0x3f] }
  0x49   : > { %v252_v27 = vld [vmem:[%s1548_s7 + $0x28] sm:$0x3f]  ;;  %v379_v28 = vld [vmem:[%s1548_s7 + $0x11] sm:$0xff]  ;;  %v380_v40 = vld [vmem:[%s1548_s7 + $0x19] sm:$0x7f]  ;;  %vm817_vm8 = vcmask 15368  }
  0x4a   : > { %v377_v29 = vld [vmem:[%s1548_s7 + $0x1] sm:$0xff]  ;;  %v383_v30 = vld [vmem:[%s1548_s7 + $0x31] sm:$0xff]  ;;  %v378_v41 = vld [vmem:[%s1548_s7 + $0x9] sm:$0x7f]  ;;  %s1409_s4 = smov 4   ;;  %vm866_vm9 = vcmask 162968  }
  0x4b   : > { %267 = vrot.lane.b32.xlu1 %v192_v0, %s1406_s29  ;;  %263 = vrot.lane.b32.xlu0 %v190_v1, %s1406_s29  ;;  %v381_v31 = vld [vmem:[%s1548_s7 + $0x21] sm:$0xff]  ;;  %v315_v32 = vld [vmem:[%s1548_s7 + $0x18] sm:$0x7f]  ;;  %v554_v44 = vld [vmem:[#allocation2 + $0x2] sm:$0x3]  ;;  %s1410_s5 = smov 127  }
  0x4c   : > { %v313_v33 = vld [vmem:[%s1548_s7 + $0x8] sm:$0x7f]  ;;  %v319_v34 = vld [vmem:[%s1548_s7 + $0x38] sm:$0x7f]  ;;  %v553_v45 = vld [vmem:[#allocation2] sm:$0x3] }
  0x4d   : > { %v317_v35 = vld [vmem:[%s1548_s7 + $0x28] sm:$0x7f]  ;;  %v443_v36 = vld [vmem:[%s1548_s7 + $0x12] sm:$0xff]  ;;  %v620_v48 = vld [vmem:[#allocation3 + $0x2] sm:$0x1]  ;;  %s1411_s8 = smov 125  }
  0x4e   : > { %v441_v37 = vld [vmem:[%s1548_s7 + $0x2] sm:$0xff]  ;;  %v447_v38 = vld [vmem:[%s1548_s7 + $0x32] sm:$0xff]  ;;  %v622_v50 = vld [vmem:[#allocation3 + $0x6] sm:$0x1]  ;;  %vm1051_vm10 = vcmask 130048   ;;  %s1866_s1 = scalar_lea.vmem [#allocation9], %s1196_s30 }
  0x4f   : > { %275 = vrot.lane.b32.xlu1 %v196_v7, %s1406_s29  ;;  %271 = vrot.lane.b32.xlu0 %v194_v5, %s1406_s29  ;;  %v445_v39 = vld [vmem:[%s1548_s7 + $0x22] sm:$0xff]  ;;  %v384_v42 = vld [vmem:[%s1548_s7 + $0x39] sm:$0x7f]  ;;  %v556_v46 = vld [vmem:[#allocation2 + $0x6] sm:$0x3]  ;;  %s1216_s15 = sshll.u32 %s1393_s12, 10 }
  0x50   : > { %v382_v43 = vld [vmem:[%s1548_s7 + $0x29] sm:$0x7f]  ;;  %v555_v47 = vld [vmem:[#allocation2 + $0x4] sm:$0x3]  ;;  %v619_v49 = vld [vmem:[#allocation3] sm:$0x1]  ;;  %s1895_s24 = scalar_lea.hbm %s1950_s2, %s1216_s15 }
  0x51   : > { %v621_v51 = vld [vmem:[#allocation3 + $0x4] sm:$0x1]  ;;  %v442_v53 = vld [vmem:[%s1548_s7 + $0xa] sm:$0x3f]  ;;  %v587_v56 = vld [vmem:[#allocation2 + $0x3] sm:$0x1] }
  0x52   : > { %v444_v52 = vld [vmem:[%s1548_s7 + $0x1a] sm:$0x3f]  ;;  %v446_v55 = vld [vmem:[%s1548_s7 + $0x2a] sm:$0x3f]  ;;  %v586_v57 = vld [vmem:[#allocation2 + $0x1] sm:$0x1] }
  0x53   : > { %332 = vrot.lane.b32.xlu1 %v192_v0, %s1406_s29  ;;  %328 = vrot.lane.b32.xlu0 %v190_v1, %s1406_s29  ;;  %v448_v54 = vld [vmem:[%s1548_s7 + $0x3a] sm:$0x3f]  ;;  %v589_v58 = vld [vmem:[#allocation2 + $0x7] sm:$0x1]  ;;  %v588_v59 = vld [vmem:[#allocation2 + $0x5] sm:$0x1] }
  0x54   : > { %v652_v60 = vld [vmem:[#allocation3 + $0x2] sm:$0x3]  ;;  %v651_v61 = vld [vmem:[#allocation3] sm:$0x3]  ;;  %v654_v62 = vld [vmem:[#allocation3 + $0x6] sm:$0x3] }
  0x55   : > { %v653_v63 = vld [vmem:[#allocation3 + $0x4] sm:$0x3]  ;;  %s1077_s17 = sshll.u32 %s1866_s1, 4  ;;  %s1061_s25 = scalar_lea.sflag [#allocation8], %s1542_s28  ;;  %s1897_s17 = int_to_ptr.vmem [resolvable:$true] %s1077_s17 }
  0x56   : > { %s1319_s26 = scalar_lea.vmem %s1897_s17, 1024  ;;  %p1958_p9 = scmp.ne.s32.totalorder %s1954_s21, 0 }
  0x57   : > { %340 = vrot.lane.b32.xlu1 %v196_v7, %s1406_s29  ;;  %336 = vrot.lane.b32.xlu0 %v194_v5, %s1406_s29  ;;  %p1320_p8 = scmp.ne.s32.totalorder %s1897_s17, %s1319_s26  ;;  %s1412_s12 = smov [#allocation9]  }
  0x58   : > { %s1323_s27 = sshll.u32 %s1412_s12, 4  ;;  %s1324_s27 = int_to_ptr.vmem [resolvable:$false] %s1323_s27 }
  0x59   : > { %p1321_p11 = pnand %p1320_p8, %p1958_p9  ;;  %s1325_s30 = scalar_lea.vmem %s1324_s27, 2048 }
  0x5a   : > { %p1326_p6 = scmp.lt.s32.totalorder %s1897_s17, %s1324_s27  ;;  %p1327_p13 = scmp.lt.s32.totalorder %s1325_s30, %s1319_s26 }
  0x5b   : > { %269 = vrot.lane.b32.xlu1 %v250_v24, %s1406_s29  ;;  %265 = vrot.lane.b32.xlu0 %v248_v25, %s1406_s29  ;;  %p1322_p0 = pneg %p1321_p11 }
  0x5c   : > { %p1328_p2 = por %p1327_p13, %p1326_p6 }
  0x5e   : > { %p1329_p5 = pnand %p1328_p2, %p1322_p0 }
  0x5f   : > { %277 = vrot.lane.b32.xlu1 %v254_v26, %s1406_s29  ;;  %273 = vrot.lane.b32.xlu0 %v252_v27, %s1406_s29 }
  0x63   : > { %397 = vrot.lane.b32.xlu1 %v379_v28, %s1406_s29  ;;  %393 = vrot.lane.b32.xlu0 %v377_v29, %s1406_s29 }
  0x67   : > { %405 = vrot.lane.b32.xlu1 %v383_v30, %s1406_s29  ;;  %401 = vrot.lane.b32.xlu0 %v381_v31, %s1406_s29 }
  0x6b   : > { %334 = vrot.lane.b32.xlu1 %v315_v32, %s1406_s29  ;;  %330 = vrot.lane.b32.xlu0 %v313_v33, %s1406_s29 }
  0x6f   : > { %342 = vrot.lane.b32.xlu1 %v319_v34, %s1406_s29  ;;  %338 = vrot.lane.b32.xlu0 %v317_v35, %s1406_s29 }
  0x73   : > { %461 = vrot.lane.b32.xlu1 %v443_v36, %s1406_s29  ;;  %457 = vrot.lane.b32.xlu0 %v441_v37, %s1406_s29 }
  0x77   : > { %469 = vrot.lane.b32.xlu1 %v447_v38, %s1406_s29  ;;  %465 = vrot.lane.b32.xlu0 %v445_v39, %s1406_s29 }
  0x7b   : > { %399 = vrot.lane.b32.xlu1 %v380_v40, %s1406_s29  ;;  %395 = vrot.lane.b32.xlu0 %v378_v41, %s1406_s29 }
  0x7f   : > { %407 = vrot.lane.b32.xlu1 %v384_v42, %s1406_s29  ;;  %403 = vrot.lane.b32.xlu0 %v382_v43, %s1406_s29 }
  0x83   : > { %563 = vrot.lane.b32.xlu1 %v554_v44, %s1406_s29  ;;  %561 = vrot.lane.b32.xlu0 %v553_v45, %s1406_s29 }
  0x87   : > { %567 = vrot.lane.b32.xlu1 %v556_v46, %s1406_s29  ;;  %565 = vrot.lane.b32.xlu0 %v555_v47, %s1406_s29 }
  0x8b   : > { %629 = vrot.lane.b32.xlu1 %v620_v48, %s1406_s29  ;;  %627 = vrot.lane.b32.xlu0 %v619_v49, %s1406_s29 }
  0x8f   : > { %633 = vrot.lane.b32.xlu1 %v622_v50, %s1406_s29  ;;  %631 = vrot.lane.b32.xlu0 %v621_v51, %s1406_s29 }
  0x93   : > { %463 = vrot.lane.b32.xlu1 %v444_v52, %s1406_s29  ;;  %459 = vrot.lane.b32.xlu0 %v442_v53, %s1406_s29 }
  0x97   : > { %471 = vrot.lane.b32.xlu1 %v448_v54, %s1406_s29  ;;  %467 = vrot.lane.b32.xlu0 %v446_v55, %s1406_s29 }
  0x9b   : > { %596 = vrot.lane.b32.xlu1 %v587_v56, %s1406_s29  ;;  %594 = vrot.lane.b32.xlu0 %v586_v57, %s1406_s29 }
  0x9f   : > { %600 = vrot.lane.b32.xlu1 %v589_v58, %s1406_s29  ;;  %598 = vrot.lane.b32.xlu0 %v588_v59, %s1406_s29 }
  0xa3   : > { %661 = vrot.lane.b32.xlu1 %v652_v60, %s1406_s29  ;;  %659 = vrot.lane.b32.xlu0 %v651_v61, %s1406_s29 }
  0xa7   : > { %665 = vrot.lane.b32.xlu1 %v654_v62, %s1406_s29  ;;  %663 = vrot.lane.b32.xlu0 %v653_v63, %s1406_s29 }
  0xad   : > { %v211_v0 = vpop.permute.xlu1 %210  ;;  %v207_v1 = vpop.permute.xlu0 %206 }
  0xae   : > { %233 = vst.msk [vmem:[#allocation4 + $0x10] sm:$0xff] %vm230_vm1, %v211_v0  ;;  %231 = vst.msk [vmem:[#allocation4] sm:$0xff] %vm230_vm1, %v207_v1 }
  0xb1   : > { %v213_v2 = vpop.permute.xlu1 %212  ;;  %v209_v3 = vpop.permute.xlu0 %208 }
  0xb2   : > { %234 = vst.msk [vmem:[#allocation4 + $0x18] sm:$0xff] %vm230_vm1, %v213_v2  ;;  %232 = vst.msk [vmem:[#allocation4 + $0x8] sm:$0xff] %vm230_vm1, %v209_v3 }
  0xb5   : > { %v217_v4 = vpop.permute.xlu1 %216  ;;  %v215_v5 = vpop.permute.xlu0 %214 }
  0xb6   : > { %236 = vst.msk [vmem:[#allocation4 + $0x28] sm:$0xff] %vm230_vm1, %v217_v4  ;;  %235 = vst.msk [vmem:[#allocation4 + $0x20] sm:$0xff] %vm230_vm1, %v215_v5 }
  0xb9   : > { %v221_v6 = vpop.permute.xlu1 %220  ;;  %v219_v7 = vpop.permute.xlu0 %218  ;;  %v241_v8 = vld [vmem:[#allocation4 + $0x12] sm:$0xff]  ;;  %v239_v10 = vld [vmem:[#allocation4 + $0x2] sm:$0xff]  ;;  %v242_v32 = vld [vmem:[#allocation4 + $0x1a] sm:$0x3f] }
  0xba   : > { %238 = vst.msk [vmem:[#allocation4 + $0x38] sm:$0xff] %vm230_vm1, %v221_v6  ;;  %237 = vst.msk [vmem:[#allocation4 + $0x30] sm:$0xff] %vm230_vm1, %v219_v7  ;;  %v240_v34 = vld [vmem:[#allocation4 + $0xa] sm:$0x3f] }
  0xbd   : > { %v268_v9 = vpop.permute.xlu1 %267  ;;  %v264_v11 = vpop.permute.xlu0 %263  ;;  %v243_v16 = vld [vmem:[#allocation4 + $0x22] sm:$0xff]  ;;  %v244_v40 = vld [vmem:[#allocation4 + $0x2a] sm:$0x3f] }
  0xbe   : > { %v289_v12 = vadd.f32 %v268_v9, %v241_v8  ;;  %v287_v13 = vadd.f32 %v264_v11, %v239_v10 }
  0xc0   : > { %298 = vst.msk [vmem:[#allocation4 + $0x12] sm:$0xff] %vm230_vm1, %v289_v12  ;;  %295 = vst.msk [vmem:[#allocation4 + $0x2] sm:$0xff] %vm230_vm1, %v287_v13 }
  0xc1   : > { %v276_v14 = vpop.permute.xlu1 %275  ;;  %v245_v15 = vld [vmem:[#allocation4 + $0x32] sm:$0xff]  ;;  %v272_v17 = vpop.permute.xlu0 %271  ;;  %v246_v38 = vld [vmem:[#allocation4 + $0x3a] sm:$0x3f] }
  0xc2   : > { %v293_v18 = vadd.f32 %v276_v14, %v245_v15  ;;  %v291_v19 = vadd.f32 %v272_v17, %v243_v16 }
  0xc4   : > { %302 = vst.msk [vmem:[#allocation4 + $0x32] sm:$0xff] %vm230_vm1, %v293_v18  ;;  %300 = vst.msk [vmem:[#allocation4 + $0x22] sm:$0xff] %vm230_vm1, %v291_v19 }
  0xc5   : > { %v333_v20 = vpop.permute.xlu1 %332  ;;  %v329_v21 = vpop.permute.xlu0 %328 }
  0xc7   : > { %v306_v22 = vld [vmem:[#allocation4 + $0x11] sm:$0xff]  ;;  %v304_v23 = vld [vmem:[#allocation4 + $0x1] sm:$0xff] }
  0xc8   : > { %v354_v24 = vadd.f32 %v333_v20, %v306_v22  ;;  %v352_v25 = vadd.f32 %v329_v21, %v304_v23 }
  0xc9   : > { %v341_v26 = vpop.permute.xlu1 %340  ;;  %v337_v27 = vpop.permute.xlu0 %336 }
  0xca   : > { %363 = vst.msk [vmem:[#allocation4 + $0x11] sm:$0xff] %vm230_vm1, %v354_v24  ;;  %360 = vst.msk [vmem:[#allocation4 + $0x1] sm:$0xff] %vm230_vm1, %v352_v25 }
  0xcb   : > { %v310_v28 = vld [vmem:[#allocation4 + $0x31] sm:$0xff]  ;;  %v308_v29 = vld [vmem:[#allocation4 + $0x21] sm:$0xff] }
  0xcc   : > { %v358_v30 = vadd.f32 %v341_v26, %v310_v28  ;;  %v356_v31 = vadd.f32 %v337_v27, %v308_v29 }
  0xcd   : > { %v270_v33 = vpop.permute.xlu1 %269  ;;  %v266_v35 = vpop.permute.xlu0 %265 }
  0xce   : > { %367 = vst.msk [vmem:[#allocation4 + $0x31] sm:$0xff] %vm230_vm1, %v358_v30  ;;  %365 = vst.msk [vmem:[#allocation4 + $0x21] sm:$0xff] %vm230_vm1, %v356_v31  ;;  %v290_v36 = vadd.f32 %v270_v33, %v242_v32  ;;  %v288_v37 = vadd.f32 %v266_v35, %v240_v34 }
  0xd0   : > { %299 = vst.msk [vmem:[#allocation4 + $0x1a] sm:$0x3f] %vm296_vm2, %v290_v36  ;;  %297 = vst.msk [vmem:[#allocation4 + $0xa] sm:$0x3f] %vm296_vm2, %v288_v37 }
  0xd1   : > { %v278_v39 = vpop.permute.xlu1 %277  ;;  %v274_v41 = vpop.permute.xlu0 %273  ;;  %v371_v44 = vld [vmem:[#allocation4 + $0x10] sm:$0xff]  ;;  %v369_v46 = vld [vmem:[#allocation4] sm:$0xff] }
  0xd2   : > { %v294_v42 = vadd.f32 %v278_v39, %v246_v38  ;;  %v292_v43 = vadd.f32 %v274_v41, %v244_v40 }
  0xd4   : > { %303 = vst.msk [vmem:[#allocation4 + $0x3a] sm:$0x3f] %vm296_vm2, %v294_v42  ;;  %301 = vst.msk [vmem:[#allocation4 + $0x2a] sm:$0x3f] %vm296_vm2, %v292_v43 }
  0xd5   : > { %v398_v45 = vpop.permute.xlu1 %397  ;;  %v394_v47 = vpop.permute.xlu0 %393  ;;  %v375_v51 = vld [vmem:[#allocation4 + $0x30] sm:$0xff]  ;;  %v373_v52 = vld [vmem:[#allocation4 + $0x20] sm:$0xff] }
  0xd6   : > { %v419_v48 = vadd.f32 %v398_v45, %v371_v44  ;;  %v417_v49 = vadd.f32 %v394_v47, %v369_v46 }
  0xd7   : > { %v307_v56 = vld [vmem:[#allocation4 + $0x19] sm:$0x7f]  ;;  %v305_v58 = vld [vmem:[#allocation4 + $0x9] sm:$0x7f] }
  0xd8   : > { %427 = vst.msk [vmem:[#allocation4 + $0x10] sm:$0xff] %vm230_vm1, %v419_v48  ;;  %425 = vst.msk [vmem:[#allocation4] sm:$0xff] %vm230_vm1, %v417_v49 }
  0xd9   : > { %v406_v50 = vpop.permute.xlu1 %405  ;;  %v402_v53 = vpop.permute.xlu0 %401 }
  0xda   : > { %v423_v54 = vadd.f32 %v406_v50, %v375_v51  ;;  %v421_v55 = vadd.f32 %v402_v53, %v373_v52 }
  0xdb   : > { %v311_v63 = vld [vmem:[#allocation4 + $0x39] sm:$0x7f]  ;;  %v309_v0 = vld [vmem:[#allocation4 + $0x29] sm:$0x7f] }
  0xdc   : > { %431 = vst.msk [vmem:[#allocation4 + $0x30] sm:$0xff] %vm230_vm1, %v423_v54  ;;  %429 = vst.msk [vmem:[#allocation4 + $0x20] sm:$0xff] %vm230_vm1, %v421_v55 }
  0xdd   : > { %v335_v57 = vpop.permute.xlu1 %334  ;;  %v331_v59 = vpop.permute.xlu0 %330 }
  0xde   : > { %v355_v60 = vadd.f32 %v335_v57, %v307_v56  ;;  %v353_v61 = vadd.f32 %v331_v59, %v305_v58 }
  0xdf   : > { %v435_v4 = vld [vmem:[#allocation4 + $0x10] sm:$0xff]  ;;  %v433_v6 = vld [vmem:[#allocation4] sm:$0xff] }
  0xe0   : > { %364 = vst.msk [vmem:[#allocation4 + $0x19] sm:$0x7f] %vm361_vm3, %v355_v60  ;;  %362 = vst.msk [vmem:[#allocation4 + $0x9] sm:$0x7f] %vm361_vm3, %v353_v61 }
  0xe1   : > { %v343_v62 = vpop.permute.xlu1 %342  ;;  %v339_v1 = vpop.permute.xlu0 %338 }
  0xe2   : > { %v359_v2 = vadd.f32 %v343_v62, %v311_v63  ;;  %v357_v3 = vadd.f32 %v339_v1, %v309_v0 }
  0xe3   : > { %v439_v11 = vld [vmem:[#allocation4 + $0x30] sm:$0xff]  ;;  %v437_v12 = vld [vmem:[#allocation4 + $0x20] sm:$0xff] }
  0xe4   : > { %368 = vst.msk [vmem:[#allocation4 + $0x39] sm:$0x7f] %vm361_vm3, %v359_v2  ;;  %366 = vst.msk [vmem:[#allocation4 + $0x29] sm:$0x7f] %vm361_vm3, %v357_v3 }
  0xe5   : > { %v462_v5 = vpop.permute.xlu1 %461  ;;  %v458_v7 = vpop.permute.xlu0 %457 }
  0xe6   : > { %v483_v8 = vadd.f32 %v462_v5, %v435_v4  ;;  %v481_v9 = vadd.f32 %v458_v7, %v433_v6 }
  0xe7   : > { %v372_v16 = vld [vmem:[#allocation4 + $0x18] sm:$0x7f]  ;;  %v370_v18 = vld [vmem:[#allocation4 + $0x8] sm:$0x7f]  ;;  %v616_v40 = vld [vmem:[#allocation4 + $0x1f] sm:$0x1] }
  0xe8   : > { %491 = vst.msk [vmem:[#allocation4 + $0x10] sm:$0xff] %vm230_vm1, %v483_v8  ;;  %489 = vst.msk [vmem:[#allocation4] sm:$0xff] %vm230_vm1, %v481_v9  ;;  %v615_v42 = vld [vmem:[#allocation4 + $0xf] sm:$0x1] }
  0xe9   : > { %v470_v10 = vpop.permute.xlu1 %469  ;;  %v466_v13 = vpop.permute.xlu0 %465 }
  0xea   : > { %v487_v14 = vadd.f32 %v470_v10, %v439_v11  ;;  %v485_v15 = vadd.f32 %v466_v13, %v437_v12 }
  0xeb   : > { %v376_v23 = vld [vmem:[#allocation4 + $0x38] sm:$0x7f]  ;;  %v374_v24 = vld [vmem:[#allocation4 + $0x28] sm:$0x7f]  ;;  %v618_v47 = vld [vmem:[#allocation4 + $0x3f] sm:$0x1] }
  0xec   : > { %495 = vst.msk [vmem:[#allocation4 + $0x30] sm:$0xff] %vm230_vm1, %v487_v14  ;;  %493 = vst.msk [vmem:[#allocation4 + $0x20] sm:$0xff] %vm230_vm1, %v485_v15  ;;  %v617_v48 = vld [vmem:[#allocation4 + $0x2f] sm:$0x1] }
  0xed   : > { %v400_v17 = vpop.permute.xlu1 %399  ;;  %v396_v19 = vpop.permute.xlu0 %395 }
  0xee   : > { %v420_v20 = vadd.f32 %v400_v17, %v372_v16  ;;  %v418_v21 = vadd.f32 %v396_v19, %v370_v18 }
  0xef   : > { %v550_v28 = vld [vmem:[#allocation4 + $0x10] sm:$0x3]  ;;  %v549_v30 = vld [vmem:[#allocation4] sm:$0x3] }
  0xf0   : > { %428 = vst.msk [vmem:[#allocation4 + $0x18] sm:$0x7f] %vm361_vm3, %v420_v20  ;;  %426 = vst.msk [vmem:[#allocation4 + $0x8] sm:$0x7f] %vm361_vm3, %v418_v21 }
  0xf1   : > { %v408_v22 = vpop.permute.xlu1 %407  ;;  %v404_v25 = vpop.permute.xlu0 %403 }
  0xf2   : > { %v424_v26 = vadd.f32 %v408_v22, %v376_v23  ;;  %v422_v27 = vadd.f32 %v404_v25, %v374_v24 }
  0xf3   : > { %v552_v35 = vld [vmem:[#allocation4 + $0x30] sm:$0x3]  ;;  %v551_v36 = vld [vmem:[#allocation4 + $0x20] sm:$0x3] }
  0xf4   : > { %432 = vst.msk [vmem:[#allocation4 + $0x38] sm:$0x7f] %vm361_vm3, %v424_v26  ;;  %430 = vst.msk [vmem:[#allocation4 + $0x28] sm:$0x7f] %vm361_vm3, %v422_v27 }
  0xf5   : > { %v564_v29 = vpop.permute.xlu1 %563  ;;  %v562_v31 = vpop.permute.xlu0 %561 }
  0xf6   : > { %v574_v32 = vadd.f32 %v564_v29, %v550_v28  ;;  %v573_v33 = vadd.f32 %v562_v31, %v549_v30 }
  0xf7   : > { %v436_v52 = vld [vmem:[#allocation4 + $0x18] sm:$0x3f]  ;;  %v434_v54 = vld [vmem:[#allocation4 + $0x8] sm:$0x3f] }
  0xf8   : > { %579 = vst.msk [vmem:[#allocation4 + $0x10] sm:$0x3] %vm577_vm4, %v574_v32  ;;  %578 = vst.msk [vmem:[#allocation4] sm:$0x3] %vm577_vm4, %v573_v33 }
  0xf9   : > { %v568_v34 = vpop.permute.xlu1 %567  ;;  %v566_v37 = vpop.permute.xlu0 %565 }
  0xfa   : > { %v576_v38 = vadd.f32 %v568_v34, %v552_v35  ;;  %v575_v39 = vadd.f32 %v566_v37, %v551_v36 }
  0xfb   : > { %v440_v59 = vld [vmem:[#allocation4 + $0x38] sm:$0x3f]  ;;  %v438_v60 = vld [vmem:[#allocation4 + $0x28] sm:$0x3f] }
  0xfc   : > { %581 = vst.msk [vmem:[#allocation4 + $0x30] sm:$0x3] %vm577_vm4, %v576_v38  ;;  %580 = vst.msk [vmem:[#allocation4 + $0x20] sm:$0x3] %vm577_vm4, %v575_v39 }
  0xfd   : > { %v630_v41 = vpop.permute.xlu1 %629  ;;  %v628_v43 = vpop.permute.xlu0 %627 }
  0xfe   : > { %v640_v44 = vadd.f32 %v630_v41, %v616_v40  ;;  %v639_v45 = vadd.f32 %v628_v43, %v615_v42 }
  0xff   : > { %v583_v0 = vld [vmem:[#allocation4 + $0x10] sm:$0x1]  ;;  %v582_v2 = vld [vmem:[#allocation4] sm:$0x1] }
 0x100   : > { %644 = vst.msk [vmem:[#allocation4 + $0x1f] sm:$0x1] %vm610_vm5, %v640_v44  ;;  %643 = vst.msk [vmem:[#allocation4 + $0xf] sm:$0x1] %vm610_vm5, %v639_v45 }
 0x101   : > { %v634_v46 = vpop.permute.xlu1 %633  ;;  %v632_v49 = vpop.permute.xlu0 %631 }
 0x102   : > { %v642_v50 = vadd.f32 %v634_v46, %v618_v47  ;;  %v641_v51 = vadd.f32 %v632_v49, %v617_v48 }
 0x103   : > { %v585_v7 = vld [vmem:[#allocation4 + $0x30] sm:$0x1]  ;;  %v584_v8 = vld [vmem:[#allocation4 + $0x20] sm:$0x1] }
 0x104   : > { %646 = vst.msk [vmem:[#allocation4 + $0x3f] sm:$0x1] %vm610_vm5, %v642_v50  ;;  %645 = vst.msk [vmem:[#allocation4 + $0x2f] sm:$0x1] %vm610_vm5, %v641_v51 }
 0x105   : > { %v464_v53 = vpop.permute.xlu1 %463  ;;  %v460_v55 = vpop.permute.xlu0 %459 }
 0x106   : > { %v484_v56 = vadd.f32 %v464_v53, %v436_v52  ;;  %v482_v57 = vadd.f32 %v460_v55, %v434_v54 }
 0x107   : > { %v648_v12 = vld [vmem:[#allocation4 + $0x1e] sm:$0x3]  ;;  %v647_v14 = vld [vmem:[#allocation4 + $0xe] sm:$0x3] }
 0x108   : > { %492 = vst.msk [vmem:[#allocation4 + $0x18] sm:$0x3f] %vm296_vm2, %v484_v56  ;;  %490 = vst.msk [vmem:[#allocation4 + $0x8] sm:$0x3f] %vm296_vm2, %v482_v57 }
 0x109   : > { %v472_v58 = vpop.permute.xlu1 %471  ;;  %v468_v61 = vpop.permute.xlu0 %467 }
 0x10a   : > { %v488_v62 = vadd.f32 %v472_v58, %v440_v59  ;;  %v486_v63 = vadd.f32 %v468_v61, %v438_v60 }
 0x10b   : > { %v650_v20 = vld [vmem:[#allocation4 + $0x3e] sm:$0x3]  ;;  %v649_v21 = vld [vmem:[#allocation4 + $0x2e] sm:$0x3] }
 0x10c   : > { %496 = vst.msk [vmem:[#allocation4 + $0x38] sm:$0x3f] %vm296_vm2, %v488_v62  ;;  %494 = vst.msk [vmem:[#allocation4 + $0x28] sm:$0x3f] %vm296_vm2, %v486_v63 }
 0x10d   : > { %v597_v1 = vpop.permute.xlu1 %596  ;;  %v595_v3 = vpop.permute.xlu0 %594 }
 0x10e   : > { %v607_v4 = vadd.f32 %v597_v1, %v583_v0  ;;  %v606_v5 = vadd.f32 %v595_v3, %v582_v2 }
 0x110   : > { %612 = vst.msk [vmem:[#allocation4 + $0x10] sm:$0x1] %vm610_vm5, %v607_v4  ;;  %611 = vst.msk [vmem:[#allocation4] sm:$0x1] %vm610_vm5, %v606_v5 }
 0x111   : > { %v601_v6 = vpop.permute.xlu1 %600  ;;  %v599_v9 = vpop.permute.xlu0 %598 }
 0x112   : > { %v609_v10 = vadd.f32 %v601_v6, %v585_v7  ;;  %v608_v11 = vadd.f32 %v599_v9, %v584_v8 }
 0x114   : > { %614 = vst.msk [vmem:[#allocation4 + $0x30] sm:$0x1] %vm610_vm5, %v609_v10  ;;  %613 = vst.msk [vmem:[#allocation4 + $0x20] sm:$0x1] %vm610_vm5, %v608_v11 }
 0x115   : > { %v662_v13 = vpop.permute.xlu1 %661  ;;  %v660_v15 = vpop.permute.xlu0 %659 }
 0x116   : > { %v672_v16 = vadd.f32 %v662_v13, %v648_v12  ;;  %v671_v17 = vadd.f32 %v660_v15, %v647_v14 }
 0x117   : > { %v679_v18 = vld [vmem:[#allocation4] sm:$0xff]  ;;  %v681_v25 = vld [vmem:[#allocation4 + $0x10] sm:$0xff] }
 0x118   : > { %676 = vst.msk [vmem:[#allocation4 + $0x1e] sm:$0x3] %vm577_vm4, %v672_v16  ;;  %675 = vst.msk [vmem:[#allocation4 + $0xe] sm:$0x3] %vm577_vm4, %v671_v17  ;;  %695 = vrot.lane.b32.xlu0 %v679_v18, %s1407_s20 }
 0x119   : > { %v666_v19 = vpop.permute.xlu1 %665  ;;  %v664_v22 = vpop.permute.xlu0 %663 }
 0x11a   : > { %v674_v23 = vadd.f32 %v666_v19, %v650_v20  ;;  %v673_v24 = vadd.f32 %v664_v22, %v649_v21 }
 0x11b   : > { %v683_v26 = vld [vmem:[#allocation4 + $0x20] sm:$0xff]  ;;  %v685_v28 = vld [vmem:[#allocation4 + $0x30] sm:$0xff] }
 0x11c   : > { %678 = vst.msk [vmem:[#allocation4 + $0x3e] sm:$0x3] %vm577_vm4, %v674_v23  ;;  %677 = vst.msk [vmem:[#allocation4 + $0x2e] sm:$0x3] %vm577_vm4, %v673_v24  ;;  %699 = vrot.lane.b32.xlu0 %v681_v25, %s1407_s20 }
 0x11f   : > { %v680_v27 = vld [vmem:[#allocation4 + $0x8] sm:$0xff]  ;;  %v682_v29 = vld [vmem:[#allocation4 + $0x18] sm:$0xff] }
 0x120   : > { %703 = vrot.lane.b32.xlu0 %v683_v26, %s1407_s20  ;;  %697 = vrot.lane.b32.xlu1 %v680_v27, %s1407_s20 }
 0x123   : > { %v684_v30 = vld [vmem:[#allocation4 + $0x28] sm:$0xff]  ;;  %v686_v31 = vld [vmem:[#allocation4 + $0x38] sm:$0xff] }
 0x124   : > { %707 = vrot.lane.b32.xlu0 %v685_v28, %s1407_s20  ;;  %701 = vrot.lane.b32.xlu1 %v682_v29, %s1407_s20 }
 0x128   : > { %705 = vrot.lane.b32.xlu1 %v684_v30, %s1407_s20 }
 0x12c   : > { %709 = vrot.lane.b32.xlu1 %v686_v31, %s1407_s20 }
 0x18a   : > { %v696_v32 = vpop.permute.xlu0 %695 }
 0x18b   : > { %720 = vst.msk [vmem:[#allocation4] sm:$0xff] %vm719_vm6, %v696_v32 }
 0x18e   : > { %v700_v33 = vpop.permute.xlu0 %699 }
 0x18f   : > { %722 = vst.msk [vmem:[#allocation4 + $0x10] sm:$0xff] %vm719_vm6, %v700_v33 }
 0x192   : > { %v698_v34 = vpop.permute.xlu1 %697  ;;  %v704_v35 = vpop.permute.xlu0 %703  ;;  %v728_v36 = vld [vmem:[#allocation4] sm:$0xff] }
 0x193   : > { %721 = vst.msk [vmem:[#allocation4 + $0x8] sm:$0xff] %vm719_vm6, %v698_v34  ;;  %724 = vst.msk [vmem:[#allocation4 + $0x20] sm:$0xff] %vm719_vm6, %v704_v35  ;;  %744 = vrot.lane.b32.xlu0 %v728_v36, %s1406_s29 }
 0x196   : > { %v702_v37 = vpop.permute.xlu1 %701  ;;  %v708_v38 = vpop.permute.xlu0 %707  ;;  %v730_v39 = vld [vmem:[#allocation4 + $0x10] sm:$0xff] }
 0x197   : > { %723 = vst.msk [vmem:[#allocation4 + $0x18] sm:$0xff] %vm719_vm6, %v702_v37  ;;  %726 = vst.msk [vmem:[#allocation4 + $0x30] sm:$0xff] %vm719_vm6, %v708_v38  ;;  %748 = vrot.lane.b32.xlu0 %v730_v39, %s1406_s29 }
 0x19a   : > { %v706_v40 = vpop.permute.xlu1 %705  ;;  %v729_v41 = vld [vmem:[#allocation4 + $0x8] sm:$0xff]  ;;  %v732_v42 = vld [vmem:[#allocation4 + $0x20] sm:$0xff] }
 0x19b   : > { %725 = vst.msk [vmem:[#allocation4 + $0x28] sm:$0xff] %vm719_vm6, %v706_v40  ;;  %746 = vrot.lane.b32.xlu1 %v729_v41, %s1406_s29  ;;  %752 = vrot.lane.b32.xlu0 %v732_v42, %s1406_s29 }
 0x19e   : > { %v710_v43 = vpop.permute.xlu1 %709  ;;  %v731_v44 = vld [vmem:[#allocation4 + $0x18] sm:$0xff]  ;;  %v734_v45 = vld [vmem:[#allocation4 + $0x30] sm:$0xff] }
 0x19f   : > { %727 = vst.msk [vmem:[#allocation4 + $0x38] sm:$0xff] %vm719_vm6, %v710_v43  ;;  %750 = vrot.lane.b32.xlu1 %v731_v44, %s1406_s29  ;;  %756 = vrot.lane.b32.xlu0 %v734_v45, %s1406_s29 }
 0x1a2   : > { %v733_v46 = vld [vmem:[#allocation4 + $0x28] sm:$0xff] }
 0x1a3   : > { %754 = vrot.lane.b32.xlu1 %v733_v46, %s1406_s29 }
 0x1a6   : > { %v735_v47 = vld [vmem:[#allocation4 + $0x38] sm:$0xff] }
 0x1a7   : > { %758 = vrot.lane.b32.xlu1 %v735_v47, %s1406_s29 }
 0x205   : > { %v745_v48 = vpop.permute.xlu0 %744 }
 0x206   : > { %769 = vst.msk [vmem:[#allocation4] sm:$0xff] %vm768_vm7, %v745_v48 }
 0x209   : > { %v749_v49 = vpop.permute.xlu0 %748 }
 0x20a   : > { %771 = vst.msk [vmem:[#allocation4 + $0x10] sm:$0xff] %vm768_vm7, %v749_v49 }
 0x20d   : > { %v747_v50 = vpop.permute.xlu1 %746  ;;  %v753_v51 = vpop.permute.xlu0 %752  ;;  %v777_v52 = vld [vmem:[#allocation4] sm:$0xff] }
 0x20e   : > { %770 = vst.msk [vmem:[#allocation4 + $0x8] sm:$0xff] %vm768_vm7, %v747_v50  ;;  %773 = vst.msk [vmem:[#allocation4 + $0x20] sm:$0xff] %vm768_vm7, %v753_v51  ;;  %793 = vrot.lane.b32.xlu0 %v777_v52, %s1408_s3 }
 0x211   : > { %v751_v53 = vpop.permute.xlu1 %750  ;;  %v757_v54 = vpop.permute.xlu0 %756  ;;  %v779_v55 = vld [vmem:[#allocation4 + $0x10] sm:$0xff] }
 0x212   : > { %772 = vst.msk [vmem:[#allocation4 + $0x18] sm:$0xff] %vm768_vm7, %v751_v53  ;;  %775 = vst.msk [vmem:[#allocation4 + $0x30] sm:$0xff] %vm768_vm7, %v757_v54  ;;  %797 = vrot.lane.b32.xlu0 %v779_v55, %s1408_s3 }
 0x215   : > { %v755_v56 = vpop.permute.xlu1 %754  ;;  %v778_v57 = vld [vmem:[#allocation4 + $0x8] sm:$0xff]  ;;  %v781_v58 = vld [vmem:[#allocation4 + $0x20] sm:$0xff] }
 0x216   : > { %774 = vst.msk [vmem:[#allocation4 + $0x28] sm:$0xff] %vm768_vm7, %v755_v56  ;;  %795 = vrot.lane.b32.xlu1 %v778_v57, %s1408_s3  ;;  %801 = vrot.lane.b32.xlu0 %v781_v58, %s1408_s3  ;;  %v1027_v56 = vld [vmem:[%s1548_s7] sm:$0xff] }
 0x219   : > { %v759_v59 = vpop.permute.xlu1 %758  ;;  %v780_v60 = vld [vmem:[#allocation4 + $0x18] sm:$0xff]  ;;  %v783_v61 = vld [vmem:[#allocation4 + $0x30] sm:$0xff] }
 0x21a   : > { %776 = vst.msk [vmem:[#allocation4 + $0x38] sm:$0xff] %vm768_vm7, %v759_v59  ;;  %799 = vrot.lane.b32.xlu1 %v780_v60, %s1408_s3  ;;  %805 = vrot.lane.b32.xlu0 %v783_v61, %s1408_s3 }
 0x21d   : > { %v782_v62 = vld [vmem:[#allocation4 + $0x28] sm:$0xff] }
 0x21e   : > { %803 = vrot.lane.b32.xlu1 %v782_v62, %s1408_s3  ;;  %v1035_v62 = vmul.f32 -0.5208333, %v1027_v56 }
 0x221   : > { %v784_v63 = vld [vmem:[#allocation4 + $0x38] sm:$0xff] }
 0x222   : > { %807 = vrot.lane.b32.xlu1 %v784_v63, %s1408_s3 }
 0x280   : > { %v794_v0 = vpop.permute.xlu0 %793 }
 0x281   : > { %818 = vst.msk [vmem:[#allocation4] sm:$0xff] %vm817_vm8, %v794_v0  ;;  %v1029_v0 = vld [vmem:[%s1548_s7 + $0x10] sm:$0xff] }
 0x284   : > { %v798_v1 = vpop.permute.xlu0 %797 }
 0x285   : > { %820 = vst.msk [vmem:[#allocation4 + $0x10] sm:$0xff] %vm817_vm8, %v798_v1 }
 0x288   : > { %v796_v2 = vpop.permute.xlu1 %795  ;;  %v802_v3 = vpop.permute.xlu0 %801  ;;  %v826_v4 = vld [vmem:[#allocation4] sm:$0xff] }
 0x289   : > { %819 = vst.msk [vmem:[#allocation4 + $0x8] sm:$0xff] %vm817_vm8, %v796_v2  ;;  %822 = vst.msk [vmem:[#allocation4 + $0x20] sm:$0xff] %vm817_vm8, %v802_v3  ;;  %842 = vrot.lane.b32.xlu0 %v826_v4, %s1409_s4 }
 0x28c   : > { %v800_v5 = vpop.permute.xlu1 %799  ;;  %v806_v6 = vpop.permute.xlu0 %805  ;;  %v828_v7 = vld [vmem:[#allocation4 + $0x10] sm:$0xff] }
 0x28d   : > { %821 = vst.msk [vmem:[#allocation4 + $0x18] sm:$0xff] %vm817_vm8, %v800_v5  ;;  %824 = vst.msk [vmem:[#allocation4 + $0x30] sm:$0xff] %vm817_vm8, %v806_v6  ;;  %846 = vrot.lane.b32.xlu0 %v828_v7, %s1409_s4  ;;  %v1037_v6 = vmul.f32 -0.5208333, %v1029_v0 }
 0x290   : > { %v804_v8 = vpop.permute.xlu1 %803  ;;  %v827_v9 = vld [vmem:[#allocation4 + $0x8] sm:$0xff]  ;;  %v830_v10 = vld [vmem:[#allocation4 + $0x20] sm:$0xff] }
 0x291   : > { %823 = vst.msk [vmem:[#allocation4 + $0x28] sm:$0xff] %vm817_vm8, %v804_v8  ;;  %844 = vrot.lane.b32.xlu1 %v827_v9, %s1409_s4  ;;  %850 = vrot.lane.b32.xlu0 %v830_v10, %s1409_s4 }
 0x294   : > { %v808_v11 = vpop.permute.xlu1 %807  ;;  %v829_v12 = vld [vmem:[#allocation4 + $0x18] sm:$0xff]  ;;  %v832_v13 = vld [vmem:[#allocation4 + $0x30] sm:$0xff] }
 0x295   : > { %825 = vst.msk [vmem:[#allocation4 + $0x38] sm:$0xff] %vm817_vm8, %v808_v11  ;;  %848 = vrot.lane.b32.xlu1 %v829_v12, %s1409_s4  ;;  %854 = vrot.lane.b32.xlu0 %v832_v13, %s1409_s4  ;;  %v1028_v12 = vld [vmem:[%s1548_s7 + $0x8] sm:$0xff]  ;;  %v1031_v13 = vld [vmem:[%s1548_s7 + $0x20] sm:$0xff] }
 0x298   : > { %v831_v14 = vld [vmem:[#allocation4 + $0x28] sm:$0xff] }
 0x299   : > { %852 = vrot.lane.b32.xlu1 %v831_v14, %s1409_s4 }
 0x29c   : > { %v833_v15 = vld [vmem:[#allocation4 + $0x38] sm:$0xff] }
 0x29d   : > { %856 = vrot.lane.b32.xlu1 %v833_v15, %s1409_s4 }
 0x2fb   : > { %v843_v16 = vpop.permute.xlu0 %842 }
 0x2fc   : > { %867 = vst.msk [vmem:[#allocation4] sm:$0xff] %vm866_vm9, %v843_v16 }
 0x2ff   : > { %v847_v17 = vpop.permute.xlu0 %846 }
 0x300   : > { %869 = vst.msk [vmem:[#allocation4 + $0x10] sm:$0xff] %vm866_vm9, %v847_v17 }
 0x303   : > { %v845_v18 = vpop.permute.xlu1 %844  ;;  %v851_v19 = vpop.permute.xlu0 %850  ;;  %v1780_v20 = vld [vmem:[#allocation4] sm:$0xff] }
 0x304   : > { %868 = vst.msk [vmem:[#allocation4 + $0x8] sm:$0xff] %vm866_vm9, %v845_v18  ;;  %871 = vst.msk [vmem:[#allocation4 + $0x20] sm:$0xff] %vm866_vm9, %v851_v19  ;;  %891 = vrot.lane.b32.xlu0 %v1780_v20, %s1410_s5 }
 0x307   : > { %v849_v21 = vpop.permute.xlu1 %848  ;;  %v855_v22 = vpop.permute.xlu0 %854  ;;  %v1785_v23 = vld [vmem:[#allocation4 + $0x10] sm:$0xff] }
 0x308   : > { %870 = vst.msk [vmem:[#allocation4 + $0x18] sm:$0xff] %vm866_vm9, %v849_v21  ;;  %873 = vst.msk [vmem:[#allocation4 + $0x30] sm:$0xff] %vm866_vm9, %v855_v22  ;;  %895 = vrot.lane.b32.xlu0 %v1785_v23, %s1410_s5  ;;  %v1039_v22 = vmul.f32 -0.5208333, %v1031_v13 }
 0x30b   : > { %v853_v24 = vpop.permute.xlu1 %852  ;;  %v1790_v25 = vld [vmem:[#allocation4 + $0x8] sm:$0xff]  ;;  %v1792_v26 = vld [vmem:[#allocation4 + $0x20] sm:$0xff] }
 0x30c   : > { %872 = vst.msk [vmem:[#allocation4 + $0x28] sm:$0xff] %vm866_vm9, %v853_v24  ;;  %893 = vrot.lane.b32.xlu1 %v1790_v25, %s1410_s5  ;;  %899 = vrot.lane.b32.xlu0 %v1792_v26, %s1410_s5 }
 0x30f   : > { %v857_v27 = vpop.permute.xlu1 %856  ;;  %v1797_v28 = vld [vmem:[#allocation4 + $0x18] sm:$0xff]  ;;  %v1799_v29 = vld [vmem:[#allocation4 + $0x30] sm:$0xff] }
 0x310   : > { %874 = vst.msk [vmem:[#allocation4 + $0x38] sm:$0xff] %vm866_vm9, %v857_v27  ;;  %897 = vrot.lane.b32.xlu1 %v1797_v28, %s1410_s5  ;;  %903 = vrot.lane.b32.xlu0 %v1799_v29, %s1410_s5 }
 0x313   : > { %v1804_v30 = vld [vmem:[#allocation4 + $0x28] sm:$0xff] }
 0x314   : > { %901 = vrot.lane.b32.xlu1 %v1804_v30, %s1410_s5  ;;  %923 = vrot.lane.b32.xlu0 %v1780_v20, %s1408_s3 }
 0x317   : > { %v1809_v31 = vld [vmem:[#allocation4 + $0x38] sm:$0xff] }
 0x318   : > { %905 = vrot.lane.b32.xlu1 %v1809_v31, %s1410_s5  ;;  %927 = vrot.lane.b32.xlu0 %v1785_v23, %s1408_s3 }
 0x31c   : > { %925 = vrot.lane.b32.xlu1 %v1790_v25, %s1408_s3  ;;  %931 = vrot.lane.b32.xlu0 %v1792_v26, %s1408_s3 }
 0x320   : > { %929 = vrot.lane.b32.xlu1 %v1797_v28, %s1408_s3  ;;  %935 = vrot.lane.b32.xlu0 %v1799_v29, %s1408_s3 }
 0x324   : > { %933 = vrot.lane.b32.xlu1 %v1804_v30, %s1408_s3  ;;  %955 = vrot.lane.b32.xlu0 %v1780_v20, %s1411_s8 }
 0x328   : > { %937 = vrot.lane.b32.xlu1 %v1809_v31, %s1408_s3  ;;  %959 = vrot.lane.b32.xlu0 %v1785_v23, %s1411_s8 }
 0x32c   : > { %957 = vrot.lane.b32.xlu1 %v1790_v25, %s1411_s8  ;;  %963 = vrot.lane.b32.xlu0 %v1792_v26, %s1411_s8 }
 0x330   : > { %961 = vrot.lane.b32.xlu1 %v1797_v28, %s1411_s8  ;;  %967 = vrot.lane.b32.xlu0 %v1799_v29, %s1411_s8 }
 0x334   : > { %965 = vrot.lane.b32.xlu1 %v1804_v30, %s1411_s8  ;;  %987 = vrot.lane.b32.xlu0 %v1780_v20, %s1407_s20 }
 0x338   : > { %969 = vrot.lane.b32.xlu1 %v1809_v31, %s1411_s8  ;;  %991 = vrot.lane.b32.xlu0 %v1785_v23, %s1407_s20 }
 0x33c   : > { %989 = vrot.lane.b32.xlu1 %v1790_v25, %s1407_s20  ;;  %995 = vrot.lane.b32.xlu0 %v1792_v26, %s1407_s20 }
 0x340   : > { %993 = vrot.lane.b32.xlu1 %v1797_v28, %s1407_s20  ;;  %999 = vrot.lane.b32.xlu0 %v1799_v29, %s1407_s20 }
 0x344   : > { %997 = vrot.lane.b32.xlu1 %v1804_v30, %s1407_s20 }
 0x348   : > { %1001 = vrot.lane.b32.xlu1 %v1809_v31, %s1407_s20 }
 0x376   : > { %v892_v32 = vpop.permute.xlu0 %891 }
 0x377   : > { %v915_v52 = vadd.f32 %v892_v32, %v1780_v20  ;;  %v1036_v20 = vmul.f32 -0.5208333, %v1028_v12 }
 0x37a   : > { %v896_v33 = vpop.permute.xlu0 %895 }
 0x37b   : > { %v917_v57 = vadd.f32 %v896_v33, %v1785_v23 }
 0x37e   : > { %v894_v34 = vpop.permute.xlu1 %893  ;;  %v900_v35 = vpop.permute.xlu0 %899 }
 0x37f   : > { %v916_v1 = vadd.f32 %v894_v34, %v1790_v25  ;;  %v919_v2 = vadd.f32 %v900_v35, %v1792_v26 }
 0x382   : > { %v898_v36 = vpop.permute.xlu1 %897  ;;  %v904_v37 = vpop.permute.xlu0 %903 }
 0x383   : > { %v918_v14 = vadd.f32 %v898_v36, %v1797_v28  ;;  %v921_v15 = vadd.f32 %v904_v37, %v1799_v29  ;;  %v1030_v28 = vld [vmem:[%s1548_s7 + $0x18] sm:$0xff]  ;;  %v1033_v29 = vld [vmem:[%s1548_s7 + $0x30] sm:$0xff] }
 0x386   : > { %v902_v38 = vpop.permute.xlu1 %901  ;;  %v924_v39 = vpop.permute.xlu0 %923 }
 0x387   : > { %v947_v55 = vadd.f32 %v924_v39, %v915_v52  ;;  %v920_v32 = vadd.f32 %v902_v38, %v1804_v30  ;;  %v1038_v39 = vmul.f32 -0.5208333, %v1030_v28  ;;  %v1032_v30 = vld [vmem:[%s1548_s7 + $0x28] sm:$0xff] }
 0x388   : > { %v1040_v52 = vmul.f32 -0.5208333, %v1032_v30 }
 0x38a   : > { %v1850_v40 = vpop.permute.xlu1 %905  ;;  %v928_v41 = vpop.permute.xlu0 %927 }
 0x38b   : > { %v949_v61 = vadd.f32 %v928_v41, %v917_v57  ;;  %v922_v38 = vadd.f32 %v1850_v40, %v1809_v31 }
 0x38e   : > { %v926_v42 = vpop.permute.xlu1 %925  ;;  %v932_v43 = vpop.permute.xlu0 %931 }
 0x38f   : > { %v948_v8 = vadd.f32 %v926_v42, %v916_v1  ;;  %v951_v9 = vadd.f32 %v932_v43, %v919_v2  ;;  %v1041_v42 = vmul.f32 -0.5208333, %v1033_v29 }
 0x392   : > { %v930_v44 = vpop.permute.xlu1 %929  ;;  %v936_v45 = vpop.permute.xlu0 %935 }
 0x393   : > { %v950_v19 = vadd.f32 %v930_v44, %v918_v14  ;;  %v953_v24 = vadd.f32 %v936_v45, %v921_v15 }
 0x396   : > { %v934_v46 = vpop.permute.xlu1 %933  ;;  %v956_v47 = vpop.permute.xlu0 %955 }
 0x397   : > { %v979_v58 = vadd.f32 %v956_v47, %v947_v55  ;;  %v952_v37 = vadd.f32 %v934_v46, %v920_v32 }
 0x39a   : > { %v1852_v48 = vpop.permute.xlu1 %937  ;;  %v960_v49 = vpop.permute.xlu0 %959 }
 0x39b   : > { %v981_v3 = vadd.f32 %v960_v49, %v949_v61 }
 0x39e   : > { %v958_v50 = vpop.permute.xlu1 %957  ;;  %v964_v51 = vpop.permute.xlu0 %963 }
 0x39f   : > { %v980_v16 = vadd.f32 %v958_v50, %v948_v8  ;;  %v983_v17 = vadd.f32 %v964_v51, %v951_v9 }
 0x3a2   : > { %v962_v53 = vpop.permute.xlu1 %961  ;;  %v968_v54 = vpop.permute.xlu0 %967 }
 0x3a3   : > { %v982_v33 = vadd.f32 %v962_v53, %v950_v19  ;;  %v985_v34 = vadd.f32 %v968_v54, %v953_v24  ;;  %v954_v54 = vadd.f32 %v1852_v48, %v922_v38 }
 0x3a6   : > { %v966_v59 = vpop.permute.xlu1 %965  ;;  %v988_v60 = vpop.permute.xlu0 %987 }
 0x3a7   : > { %v1011_v63 = vadd.f32 %v988_v60, %v979_v58  ;;  %v984_v50 = vadd.f32 %v966_v59, %v952_v37  ;;  %v1034_v58 = vld [vmem:[%s1548_s7 + $0x38] sm:$0xff] }
 0x3a8   : > { %v1042_v61 = vmul.f32 -0.5208333, %v1034_v58 }
 0x3a9   : > { %v1019_v4 = vmul.f32 0.020833334, %v1011_v63 }
 0x3aa   : > { %v970_v5 = vpop.permute.xlu1 %969  ;;  %v992_v7 = vpop.permute.xlu0 %991 }
 0x3ab   : > { %v1043_v10 = vadd.f32 %v1035_v62, %v1019_v4  ;;  %v1013_v11 = vadd.f32 %v992_v7, %v981_v3  ;;  %v986_v31 = vadd.f32 %v970_v5, %v954_v54 }
 0x3ad   : > { %1052 = vst.msk [vmem:[%s1866_s1] sm:$0xff] %vm1051_vm10, %v1043_v10  ;;  %v1021_v18 = vmul.f32 0.020833334, %v1013_v11 }
 0x3ae   : > { %v990_v21 = vpop.permute.xlu1 %989  ;;  %v996_v23 = vpop.permute.xlu0 %995 }
 0x3af   : > { %v1045_v25 = vadd.f32 %v1037_v6, %v1021_v18  ;;  %v1012_v26 = vadd.f32 %v990_v21, %v980_v16  ;;  %v1015_v27 = vadd.f32 %v996_v23, %v983_v17 }
 0x3b1   : > { %1054 = vst.msk [vmem:[%s1866_s1 + $0x10] sm:$0xff] %vm1051_vm10, %v1045_v25  ;;  %v1020_v35 = vmul.f32 0.020833334, %v1012_v26  ;;  %v1023_v36 = vmul.f32 0.020833334, %v1015_v27 }
 0x3b2   : > { %v994_v41 = vpop.permute.xlu1 %993  ;;  %v1000_v43 = vpop.permute.xlu0 %999 }
 0x3b3   : > { %v1044_v44 = vadd.f32 %v1036_v20, %v1020_v35  ;;  %v1047_v45 = vadd.f32 %v1039_v22, %v1023_v36  ;;  %v1014_v47 = vadd.f32 %v994_v41, %v982_v33  ;;  %v1017_v49 = vadd.f32 %v1000_v43, %v985_v34 }
 0x3b5   : > { %1053 = vst.msk [vmem:[%s1866_s1 + $0x8] sm:$0xff] %vm1051_vm10, %v1044_v44  ;;  %1056 = vst.msk [vmem:[%s1866_s1 + $0x20] sm:$0xff] %vm1051_vm10, %v1047_v45  ;;  %v1022_v46 = vmul.f32 0.020833334, %v1014_v47  ;;  %v1025_v51 = vmul.f32 0.020833334, %v1017_v49 }
 0x3b6   : > { %v998_v53 = vpop.permute.xlu1 %997 }
 0x3b7   : > { %v1046_v55 = vadd.f32 %v1038_v39, %v1022_v46  ;;  %v1049_v56 = vadd.f32 %v1041_v42, %v1025_v51  ;;  %v1016_v57 = vadd.f32 %v998_v53, %v984_v50 }
 0x3b9   : > { %1055 = vst.msk [vmem:[%s1866_s1 + $0x18] sm:$0xff] %vm1051_vm10, %v1046_v55  ;;  %1058 = vst.msk [vmem:[%s1866_s1 + $0x30] sm:$0xff] %vm1051_vm10, %v1049_v56  ;;  %v1024_v40 = vmul.f32 0.020833334, %v1016_v57 }
 0x3ba   : > { %v1002_v59 = vpop.permute.xlu1 %1001 }
 0x3bb   : > { %v1048_v60 = vadd.f32 %v1040_v52, %v1024_v40  ;;  %v1018_v62 = vadd.f32 %v1002_v59, %v986_v31 }
 0x3bd   : > { %1057 = vst.msk [vmem:[%s1866_s1 + $0x28] sm:$0xff] %vm1051_vm10, %v1048_v60  ;;  %v1026_v48 = vmul.f32 0.020833334, %v1018_v62 }
 0x3bf   : > { %v1050_v63 = vadd.f32 %v1042_v61, %v1026_v48 }
 0x3c1   : > { %1059 = vst.msk [vmem:[%s1866_s1 + $0x38] sm:$0xff] %vm1051_vm10, %v1050_v63 }
 0x3c2   : > { %1332 = shalt.err (!%p1329_p5)
}
 0x3c3   : > { %s1333_s6 = scalar_lea.hbm %s1895_s24, 1024  ;;  %s1337_s20 = scalar_lea.hbm %s1950_s2, 2048 }
 0x3c4   : > { %p1334_p4 = scmp.ne.s32.totalorder %s1895_s24, %s1333_s6  ;;  %p1338_p12 = scmp.lt.u32.totalorder %s1895_s24, %s1950_s2 }
 0x3c5   : > { %p1339_p1 = scmp.lt.u32.totalorder %s1337_s20, %s1333_s6  ;;  %p1341_p8 = scmp.lt.u32.totalorder %s1333_s6, %s1895_s24 }
 0x3c6   : > { %p1335_p7 = pnand %p1334_p4, %p1958_p9 }
 0x3c7   : > { %p1340_p3 = por %p1339_p1, %p1338_p12 }
 0x3c8   : > { %p1336_p10 = pneg %p1335_p7 }
 0x3c9   : > { %p1342_p11 = por %p1341_p8, %p1340_p3 }
 0x3cb   : > { %p1343_p0 = pnand %p1342_p11, %p1336_p10 }
 0x3cd   : > { %1346 = shalt.err (!%p1343_p0)
}
 0x3ce   : > { %s1413_s5 = smov 128   ;;  %s1414_s8 = smov 8  }
 0x3cf   : > { %1219 = dma.vmem_to_hbm [thread:$0]  (%p1958_p9), %s1897_s17, 1024, %s1895_s24, %s1061_s25, %s1413_s5, %s1413_s5, %s1414_s8  }
 0x3d0 PF: > { %s1092_s1 = sand.u32 1, %s1381_s9   ;;  %p1959_p6 = scmp.ne.s32.totalorder %s1955_s23, 0 }
 0x3d1   : > { %p1960_p13 = scmp.ge.s32.totalorder %s1401_s14, 2  ;;  %s1093_s15 = scalar_lea.sflag [#allocation8], %s1092_s1 }
 0x3d3   : > { %p1226_p2 = pnand %p1960_p13, %p1959_p6 }
 0x3d5   : > { %1376 = dma.done.wait (!%p1226_p2), %s1093_s15, 1024  }
 0x3d6   : > { %1378 = vsyncadd (!%p1226_p2), %s1093_s15, 4294966272  ;;  %s18_s14 = sadd.s32 1, %s1401_s14   ;;  %s1961_s9 = smov %s1385_s10 }
 0x3d7   : > { %p15_p5 = scmp.ge.s32.totalorder %s18_s14, 4   ;;  %s1962_s10 = smov %s1389_s11 }
 0x3d8   : > { %s1963_s11 = smov %s1486_s22  ;;  %s1964_s12 = smov %s1397_s13 }
 0x3d9   : > { %s1965_s13 = smov %s1967_s16  ;;  %17 = sbr.rel (!%p15_p5) target bundleno = 6 (0x6), region = 94 }
 0x3e0   :  { %1098 = vsyncpa [#allocation7], 1 }
 0x3e1   :  { %1100 = vsyncpa [#allocation7 + $0x1], 1 }
 0x3e2   :  { %1101 = vsyncpa [#allocation8], 1 }
 0x3e3   :  { %1103 = vsyncpa [#allocation8 + $0x1], 1 }
 0x3e4   :  { %1104 = vsyncmov [#allocation5] }
 0x3e7   :  { %s1105_s21 = vpop.sfrf %1104 }
 0x3e8   :  { %p1209_p9 = scmp.ne.s32.totalorder %s1105_s21, 0 }
 0x3ea   :  { %1109 = shalt.err (%p1209_p9)  }
 0x3eb   :  { %1111 = vsyncmov [#allocation5 + $0x1] }
 0x3ee   :  { %s1112_s23 = vpop.sfrf %1111 }
 0x3ef   :  { %p1210_p4 = scmp.ne.s32.totalorder %s1112_s23, 0 }
 0x3f1   :  { %1116 = shalt.err (%p1210_p4)  }

</bundles_post_ra>
